<compile_context>
chip_gen: v6e
topology: v6e:2x2x1
jax: 0.10.0
libtpu: 0.0.40
codegen_flags: <defaults>
</compile_context>

<pallas_src>
import jax
import jax.numpy as jnp
from jax import lax
from jax.experimental import pallas as pl
from jax.experimental.pallas import tpu as pltpu


# -----------------------------------------------------------------------------
# helpers
# -----------------------------------------------------------------------------
def _round_up(x, m):
    return ((x + m - 1) // m) * m


def _pad_channels(c):
    # 128 lanes minimum; 256-wide for large channel counts (v6e/v7x MXU is 2x256x256).
    return _round_up(c, 256) if c >= 256 else _round_up(c, 128)


def _vmem_limit_bytes():
    # Explicit scoped-VMEM budget: ~3/4 of physical, capped at 100 MiB; fall back to
    # the compiler default if the query is unavailable.
    try:
        cap = int(pltpu.get_tpu_info().vmem_capacity_bytes)
        return min(cap * 3 // 4, 100 * 1024 * 1024)
    except Exception:
        return None


_VMEM_LIMIT = _vmem_limit_bytes()


def _cparams(dims):
    kw = dict(dimension_semantics=dims)
    if _VMEM_LIMIT is not None:
        kw["vmem_limit_bytes"] = _VMEM_LIMIT
    return pltpu.CompilerParams(**kw)


# ConvTranspose2d(k=4, s=2, p=1) sub-pixel taps: output row-parity rh uses kernel rows
# Kh(rh) applied to input rows shifted by dh (same decomposition for columns).
_TAPS = (((1, 0), (3, -1)),   # rh == 0: (kh=1, dh=0), (kh=3, dh=-1)
         ((0, 1), (2, 0)))    # rh == 1: (kh=0, dh=+1), (kh=2, dh=0)


# -----------------------------------------------------------------------------
# Pallas kernels
# -----------------------------------------------------------------------------
def _down_kernel(s_ref, w_ref, y_ref):
    """Fused LeakyReLU(0.2) + Conv2d(k=4,s=2,p=1) + ReLU for one image.

    s_ref: (1, Ho+1, Wo+1, 4*Cin) bf16 space-to-depth view of the zero-padded input.
    w_ref: (16*Cin, C1p)          bf16 resident weight matrix.
    y_ref: (1, Ho*Wo, C1p)        bf16 output (the up-path ReLU is fused here).
    """
    hp, wp, k4 = s_ref.shape[1], s_ref.shape[2], s_ref.shape[3]
    ho, wo = hp - 1, wp - 1
    s = s_ref[0]
    s = jnp.where(s >= 0, s, 0.2 * s)          # LeakyReLU; leaky(0)=0 keeps padding valid
    views = [s[dp:dp + ho, dq:dq + wo, :] for dp in (0, 1) for dq in (0, 1)]
    p = jnp.concatenate(views, axis=-1).reshape(ho * wo, 4 * k4)
    z = jnp.dot(p, w_ref[...], preferred_element_type=jnp.float32)
    y_ref[0] = jnp.maximum(z, 0.0).astype(y_ref.dtype)


def _up_kernel(y_ref, w_ref, z_ref, s_ref):
    """ConvTranspose2d(k=4,s=2,p=1) via sub-pixel phases, one image per grid step.

    y_ref: (1, Ho+2, Wo+2, Cip)  bf16 zero-padded, ReLU'd down activations.
    w_ref: (4, 4*Cip, Cop)       bf16 per-phase weights (resident).
    z_ref: (1, Ho, 2, Wo, 2*Cop) bf16 pre-BN output; its NHWC view is a free reshape.
    s_ref: (1, 2, Cop)           f32 partial BN stats: row 0 = sum, row 1 = sum of sq.
    """
    hp, wp, cip = y_ref.shape[1], y_ref.shape[2], y_ref.shape[3]
    ho, wo = hp - 2, wp - 2
    cop = s_ref.shape[2]
    y = y_ref[0]
    ssum = jnp.zeros((1, cop), jnp.float32)
    ssq = jnp.zeros((1, cop), jnp.float32)
    for rh in (0, 1):
        for rw in (0, 1):
            views = [y[1 + dh:1 + dh + ho, 1 + dw:1 + dw + wo, :]
                     for (_, dh) in _TAPS[rh] for (_, dw) in _TAPS[rw]]
            p = jnp.concatenate(views, axis=-1).reshape(ho * wo, 4 * cip)
            z = jnp.dot(p, w_ref[rh * 2 + rw], preferred_element_type=jnp.float32)
            ssum = ssum + jnp.sum(z, axis=0, keepdims=True)
            ssq = ssq + jnp.sum(z * z, axis=0, keepdims=True)
            # Write phase (rh, rw) directly into the interleaved layout: static int
            # index on a leading dim + a 128-aligned lane slice (lane-dense store).
            z_ref[0, :, rh, :, rw * cop:(rw + 1) * cop] = (
                z.reshape(ho, wo, cop).astype(z_ref.dtype))
    s_ref[0, 0:1, :] = ssum
    s_ref[0, 1:2, :] = ssq


def _bn_apply_kernel(z_ref, scale_ref, shift_ref, o_ref):
    # z_ref: (TILE, C) bf16; scale/shift: (1, C) f32 per-channel affine.
    o_ref[...] = z_ref[...].astype(jnp.float32) * scale_ref[...] + shift_ref[...]


# -----------------------------------------------------------------------------
# pallas_call wrappers
# -----------------------------------------------------------------------------
def _down_call(s2d, w1, ho, wo):
    n, hp, wp, k4 = s2d.shape
    c1p = w1.shape[1]
    return pl.pallas_call(
        _down_kernel,
        out_shape=jax.ShapeDtypeStruct((n, ho * wo, c1p), jnp.bfloat16),
        grid=(n,),
        in_specs=[pl.BlockSpec((1, hp, wp, k4), lambda i: (i, 0, 0, 0)),
                  pl.BlockSpec((4 * k4, c1p), lambda i: (0, 0))],
        out_specs=pl.BlockSpec((1, ho * wo, c1p), lambda i: (i, 0, 0)),
        compiler_params=_cparams(("parallel",)),
    )(s2d, w1)


def _up_call(y1p, w_ph):
    n, hp, wp, cip = y1p.shape
    ho, wo = hp - 2, wp - 2
    cop = w_ph.shape[-1]
    return pl.pallas_call(
        _up_kernel,
        out_shape=(jax.ShapeDtypeStruct((n, ho, 2, wo, 2 * cop), jnp.bfloat16),
                   jax.ShapeDtypeStruct((n, 2, cop), jnp.float32)),
        grid=(n,),
        in_specs=[pl.BlockSpec((1, hp, wp, cip), lambda i: (i, 0, 0, 0)),
                  pl.BlockSpec((4, 4 * cip, cop), lambda i: (0, 0, 0))],
        out_specs=(pl.BlockSpec((1, ho, 2, wo, 2 * cop), lambda i: (i, 0, 0, 0, 0)),
                   pl.BlockSpec((1, 2, cop), lambda i: (i, 0, 0))),
        compiler_params=_cparams(("parallel",)),
    )(y1p, w_ph)


def _bn_apply_call(z_flat, scale, shift):
    m, c = z_flat.shape
    # Pure HBM streaming: big lane-dense tiles, but keep >= 2 blocks for v7x megacore.
    tile = min(1024, _round_up(max(pl.cdiv(m, 2), 8), 8))
    return pl.pallas_call(
        _bn_apply_kernel,
        out_shape=jax.ShapeDtypeStruct((m, c), jnp.float32),
        grid=(pl.cdiv(m, tile),),
        in_specs=[pl.BlockSpec((tile, c), lambda i: (i, 0)),
                  pl.BlockSpec((1, c), lambda i: (0, 0)),
                  pl.BlockSpec((1, c), lambda i: (0, 0))],
        out_specs=pl.BlockSpec((tile, c), lambda i: (i, 0)),
        compiler_params=_cparams(("parallel",)),
    )(z_flat, scale, shift)


# -----------------------------------------------------------------------------
# Plain-JAX glue: space-to-depth view and weight relayout (all tiny / one pass)
# -----------------------------------------------------------------------------
def _space_to_depth(x_nhwc):
    """Zero-pad by 1 and fold the 2x2 parity into channels: the k=4,s=2 conv becomes a
    k=2,s=1 conv on this array (contiguous taps, no strided loads in-kernel)."""
    n, h, w, c = x_nhwc.shape
    ho, wo = h // 2, w // 2
    xp = jnp.pad(x_nhwc, ((0, 0), (1, 1), (1, 1), (0, 0)))
    s = xp.reshape(n, ho + 1, 2, wo + 1, 2, c).transpose(0, 1, 3, 2, 4, 5)
    return s.reshape(n, ho + 1, wo + 1, 4 * c)


def _down_weights(w_down, c1p):
    """Torch Conv2d (oc, ic, kh, kw) -> (16*ic, c1p) with row order (dp, dq, i, j, ic)
    matching the kernel's tap/space-to-depth channel order."""
    oc, ic = w_down.shape[0], w_down.shape[1]
    w = w_down.reshape(oc, ic, 2, 2, 2, 2)                   # (oc, ic, dp, i, dq, j)
    w = jnp.transpose(w, (2, 4, 3, 5, 1, 0)).reshape(16 * ic, oc)
    return jnp.pad(w, ((0, 0), (0, c1p - oc))).astype(jnp.bfloat16)


def _phase_weights(w_up, cip, cop):
    """Torch ConvTranspose2d (ic, oc, kh, kw) -> (4, 4*cip, cop); row order matches the
    kernel's tap order; padded rows/cols are zero so they never contribute."""
    ci, co = w_up.shape[0], w_up.shape[1]
    w = jnp.pad(w_up, ((0, cip - ci), (0, cop - co), (0, 0), (0, 0)))
    mats = []
    for rh in (0, 1):
        for rw in (0, 1):
            cols = [w[:, :, kh, kw] for (kh, _) in _TAPS[rh] for (kw, _) in _TAPS[rw]]
            mats.append(jnp.concatenate(cols, axis=0))       # (4*cip, cop)
    return jnp.stack(mats, axis=0).astype(jnp.bfloat16)      # (4, 4*cip, cop)


def init_params(key, input_nc, inner_nc, outer_nc):
    k1, k2, k3, k4 = jax.random.split(key, 4)
    # Torch layouts: Conv2d weight (out,in,4,4); ConvTranspose2d weight (in,out,4,4).
    w_down = 0.02 * jax.random.normal(k1, (inner_nc, input_nc, 4, 4), jnp.float32)
    w_up = 0.02 * jax.random.normal(k2, (inner_nc, outer_nc, 4, 4), jnp.float32)
    gamma = 1.0 + 0.1 * jax.random.normal(k3, (outer_nc,), jnp.float32)
    beta = 0.1 * jax.random.normal(k4, (outer_nc,), jnp.float32)
    return {"w_down": w_down, "w_up": w_up, "gamma": gamma, "beta": beta}


# -----------------------------------------------------------------------------
# Forward pass
# -----------------------------------------------------------------------------
def unet_skip_block_innermost(x_nchw, params):
    """cat([x, upnorm(upconv(relu(downconv(leaky_relu(x)))))], ch dim). NCHW in/out."""
    n, cin, h, w = x_nchw.shape
    inner_nc = params["w_down"].shape[0]
    outer_nc = params["w_up"].shape[1]
    ho, wo = h // 2, w // 2
    c1p = _pad_channels(inner_nc)
    cop = _pad_channels(outer_nc)

    # ---- down path (LeakyReLU + conv + fused up-ReLU, one image per grid step) ----
    x_nhwc = jnp.transpose(x_nchw, (0, 2, 3, 1))
    s2d = _space_to_depth(x_nhwc).astype(jnp.bfloat16)        # one input-sized relayout
    w1 = _down_weights(params["w_down"], c1p)
    y1 = _down_call(s2d, w1, ho, wo)                          # (N, Ho*Wo, C1p) bf16

    # ---- up path, pass 1: phase matmuls + interleaved pre-BN output + partial stats ----
    y1p = jnp.pad(y1.reshape(n, ho, wo, c1p), ((0, 0), (1, 1), (1, 1), (0, 0)))
    w_ph = _phase_weights(params["w_up"], c1p, cop)
    z6, stats = _up_call(y1p, w_ph)                           # z6 (N,Ho,2,Wo,2*Cop) bf16

    # ---- BatchNorm2d statistics (training mode: biased variance, eps=1e-5) ----
    total = jnp.sum(stats, axis=0)                            # (2, Cop)
    count = jnp.float32(n * h * w)
    mean = total[0] / count
    var = total[1] / count - mean * mean
    gamma = jnp.pad(params["gamma"], (0, cop - outer_nc))
    beta = jnp.pad(params["beta"], (0, cop - outer_nc))
    scale = gamma * lax.rsqrt(jnp.maximum(var, 0.0) + 1e-5)
    shift = beta - mean * scale

    # ---- up path, pass 2: streaming BN apply over the FREE NHWC view of z6 ----
    z_flat = z6.reshape(n * h * w, cop)                       # free reshape (layout trick)
    bn = _bn_apply_call(z_flat, scale.reshape(1, cop), shift.reshape(1, cop))
    z_bn = bn.reshape(n, h, w, cop)[..., :outer_nc]

    # ---- skip connection: concat in NCHW so x is never transposed twice ----
    # TODO(synk): if the caller can consume NHWC, drop this transpose entirely.
    return jnp.concatenate([x_nchw, jnp.transpose(z_bn, (0, 3, 1, 2))], axis=1)


if __name__ == "__main__":
    key = jax.random.PRNGKey(0)
    kx, kp = jax.random.split(key)

    N, Cin, H, W = 2, 4, 16, 16
    outer_nc, inner_nc = 4, 8            # input_nc defaults to outer_nc in the module

    x = jax.random.normal(kx, (N, Cin, H, W), jnp.float32)
    params = init_params(kp, Cin, inner_nc, outer_nc)

    fwd = jax.jit(unet_skip_block_innermost)
    out = jax.block_until_ready(fwd(x, params))
    assert out.shape == (N, Cin + outer_nc, H, W), out.shape
    assert bool(jnp.all(jnp.isfinite(out)))
    print("KERNEL_OK")
</pallas_src>

<mosaic_0001>
module attributes {stable_mosaic.version = 11 : i64} {
  func.func @_down_kernel(%arg0: i32, %arg1: memref<1x9x9x16xbf16, #tpu.memory_space<vmem>>, %arg2: memref<64x128xbf16, #tpu.memory_space<vmem>>, %arg3: memref<1x64x128xbf16, #tpu.memory_space<vmem>>) attributes {dimension_semantics = [#tpu.dimension_semantics<parallel>], iteration_bounds = array<i64: 2>, scalar_prefetch = 0 : i64, scratch_operands = 0 : i64, tpu.core_type = #tpu.core_type<tc>, window_params = [{transform_indices = @transform_0, window_bounds = array<i64: 1, 9, 9, 16>}, {pipeline_mode = #tpu.pipeline_mode<synchronous>, transform_indices = @transform_1, window_bounds = array<i64: 64, 128>}, {transform_indices = @transform_2, window_bounds = array<i64: 1, 64, 128>}]} {
    %c0 = arith.constant 0 : index
    %c0_0 = arith.constant 0 : index
    %c0_1 = arith.constant 0 : index
    %c0_2 = arith.constant 0 : index
    %0 = vector.load %arg1[%c0, %c0_0, %c0_1, %c0_2] : memref<1x9x9x16xbf16, #tpu.memory_space<vmem>>, vector<1x9x9x16xbf16>
    %1 = vector.shape_cast %0 : vector<1x9x9x16xbf16> to vector<9x9x16xbf16>
    %cst = arith.constant 0.000000e+00 : bf16
    %2 = vector.broadcast %cst : bf16 to vector<9x9x16xbf16>
    %3 = arith.cmpf oge, %1, %2 : vector<9x9x16xbf16>
    %cst_3 = arith.constant 2.001950e-01 : bf16
    %4 = vector.broadcast %cst_3 : bf16 to vector<9x9x16xbf16>
    %5 = arith.mulf %4, %1 : vector<9x9x16xbf16>
    %6 = arith.select %3, %1, %5 : vector<9x9x16xi1>, vector<9x9x16xbf16>
    %7 = vector.extract_strided_slice %6 {offsets = [0, 0, 0], sizes = [8, 8, 16], strides = [1, 1, 1]} : vector<9x9x16xbf16> to vector<8x8x16xbf16>
    %8 = vector.extract_strided_slice %6 {offsets = [0, 1, 0], sizes = [8, 8, 16], strides = [1, 1, 1]} : vector<9x9x16xbf16> to vector<8x8x16xbf16>
    %9 = vector.extract_strided_slice %6 {offsets = [1, 0, 0], sizes = [8, 8, 16], strides = [1, 1, 1]} : vector<9x9x16xbf16> to vector<8x8x16xbf16>
    %10 = vector.extract_strided_slice %6 {offsets = [1, 1, 0], sizes = [8, 8, 16], strides = [1, 1, 1]} : vector<9x9x16xbf16> to vector<8x8x16xbf16>
    %11 = tpu.concatenate %7, %8, %9, %10 in 2 : vector<8x8x16xbf16>, vector<8x8x16xbf16>, vector<8x8x16xbf16>, vector<8x8x16xbf16> -> vector<8x8x64xbf16>
    %12 = vector.shape_cast %11 : vector<8x8x64xbf16> to vector<64x64xbf16>
    %c0_4 = arith.constant 0 : index
    %c0_5 = arith.constant 0 : index
    %13 = vector.load %arg2[%c0_4, %c0_5] : memref<64x128xbf16, #tpu.memory_space<vmem>>, vector<64x128xbf16>
    %cst_6 = arith.constant dense<0.000000e+00> : vector<64x128xf32>
    %14 = tpu.matmul %12, %13, %cst_6 {dimension_numbers = #tpu.dot_dimension_numbers<[1], [0], [0], [1], [0, 0, 1, 1], [], []>} : vector<64x64xbf16>, vector<64x128xbf16>, vector<64x128xf32> -> vector<64x128xf32>
    %cst_7 = arith.constant 0.000000e+00 : f32
    %15 = vector.broadcast %cst_7 : f32 to vector<64x128xf32>
    %16 = arith.maximumf %14, %15 : vector<64x128xf32>
    %17 = arith.truncf %16 : vector<64x128xf32> to vector<64x128xbf16>
    %c0_8 = arith.constant 0 : index
    %c0_9 = arith.constant 0 : index
    %c0_10 = arith.constant 0 : index
    %18 = vector.load %arg3[%c0_8, %c0_9, %c0_10] : memref<1x64x128xbf16, #tpu.memory_space<vmem>>, vector<1x64x128xbf16>
    %19 = vector.shape_cast %18 : vector<1x64x128xbf16> to vector<64x128xbf16>
    %20 = vector.shape_cast %17 : vector<64x128xbf16> to vector<1x64x128xbf16>
    tpu.vector_store %arg3[%c0_8, %c0_9, %c0_10], %20 {strides = array<i32>} : memref<1x64x128xbf16, #tpu.memory_space<vmem>>, vector<1x64x128xbf16>,
    return
  }
  func.func @transform_0(%arg0: i32) -> (i32, i32, i32, i32) {
    %c0_i32 = arith.constant 0 : i32
    %c0_i32_0 = arith.constant 0 : i32
    %c0_i32_1 = arith.constant 0 : i32
    %c0_i32_2 = arith.constant 0 : i32
    return %arg0, %c0_i32, %c0_i32_0, %c0_i32_1 : i32, i32, i32, i32
  }
  func.func @transform_1(%arg0: i32) -> (i32, i32) {
    %c0_i32 = arith.constant 0 : i32
    %c0_i32_0 = arith.constant 0 : i32
    %c0_i32_1 = arith.constant 0 : i32
    return %c0_i32, %c0_i32_0 : i32, i32
  }
  func.func @transform_2(%arg0: i32) -> (i32, i32, i32) {
    %c0_i32 = arith.constant 0 : i32
    %c0_i32_0 = arith.constant 0 : i32
    %c0_i32_1 = arith.constant 0 : i32
    return %arg0, %c0_i32, %c0_i32_0 : i32, i32, i32
  }
}

module attributes {stable_mosaic.version = 11 : i64} {
  func.func @_up_kernel(%arg0: i32, %arg1: memref<1x10x10x128xbf16, #tpu.memory_space<vmem>>, %arg2: memref<4x512x128xbf16, #tpu.memory_space<vmem>>, %arg3: memref<1x8x2x8x256xbf16, #tpu.memory_space<vmem>>, %arg4: memref<1x2x128xf32, #tpu.memory_space<vmem>>) attributes {dimension_semantics = [#tpu.dimension_semantics<parallel>], iteration_bounds = array<i64: 2>, scalar_prefetch = 0 : i64, scratch_operands = 0 : i64, tpu.core_type = #tpu.core_type<tc>, window_params = [{transform_indices = @transform_0, window_bounds = array<i64: 1, 10, 10, 128>}, {pipeline_mode = #tpu.pipeline_mode<synchronous>, transform_indices = @transform_1, window_bounds = array<i64: 4, 512, 128>}, {transform_indices = @transform_2, window_bounds = array<i64: 1, 8, 2, 8, 256>}, {transform_indices = @transform_3, window_bounds = array<i64: 1, 2, 128>}]} {
    %c0 = arith.constant 0 : index
    %c0_0 = arith.constant 0 : index
    %c0_1 = arith.constant 0 : index
    %c0_2 = arith.constant 0 : index
    %0 = vector.load %arg1[%c0, %c0_0, %c0_1, %c0_2] : memref<1x10x10x128xbf16, #tpu.memory_space<vmem>>, vector<1x10x10x128xbf16>
    %1 = vector.shape_cast %0 : vector<1x10x10x128xbf16> to vector<10x10x128xbf16>
    %cst = arith.constant 0.000000e+00 : f32
    %2 = vector.broadcast %cst : f32 to vector<1x128xf32>
    %cst_3 = arith.constant 0.000000e+00 : f32
    %3 = vector.broadcast %cst_3 : f32 to vector<1x128xf32>
    %4 = vector.extract_strided_slice %1 {offsets = [1, 1, 0], sizes = [8, 8, 128], strides = [1, 1, 1]} : vector<10x10x128xbf16> to vector<8x8x128xbf16>
    %5 = vector.extract_strided_slice %1 {offsets = [1, 0, 0], sizes = [8, 8, 128], strides = [1, 1, 1]} : vector<10x10x128xbf16> to vector<8x8x128xbf16>
    %6 = vector.extract_strided_slice %1 {offsets = [0, 1, 0], sizes = [8, 8, 128], strides = [1, 1, 1]} : vector<10x10x128xbf16> to vector<8x8x128xbf16>
    %7 = vector.extract_strided_slice %1 {offsets = [0, 0, 0], sizes = [8, 8, 128], strides = [1, 1, 1]} : vector<10x10x128xbf16> to vector<8x8x128xbf16>
    %8 = tpu.concatenate %4, %5, %6, %7 in 2 : vector<8x8x128xbf16>, vector<8x8x128xbf16>, vector<8x8x128xbf16>, vector<8x8x128xbf16> -> vector<8x8x512xbf16>
    %9 = vector.shape_cast %8 : vector<8x8x512xbf16> to vector<64x512xbf16>
    %c0_4 = arith.constant 0 : index
    %c0_5 = arith.constant 0 : index
    %c0_6 = arith.constant 0 : index
    %10 = vector.load %arg2[%c0_4, %c0_5, %c0_6] : memref<4x512x128xbf16, #tpu.memory_space<vmem>>, vector<1x512x128xbf16>
    %11 = vector.shape_cast %10 : vector<1x512x128xbf16> to vector<512x128xbf16>
    %cst_7 = arith.constant dense<0.000000e+00> : vector<64x128xf32>
    %12 = tpu.matmul %9, %11, %cst_7 {dimension_numbers = #tpu.dot_dimension_numbers<[1], [0], [0], [1], [0, 0, 1, 1], [], []>} : vector<64x512xbf16>, vector<512x128xbf16>, vector<64x128xf32> -> vector<64x128xf32>
    %cst_8 = arith.constant dense<0.000000e+00> : vector<128xf32>
    %13 = vector.multi_reduction <add>, %12, %cst_8 [0] : vector<64x128xf32> to vector<128xf32>
    %14 = vector.shape_cast %13 : vector<128xf32> to vector<1x128xf32>
    %15 = arith.addf %2, %14 : vector<1x128xf32>
    %16 = arith.mulf %12, %12 : vector<64x128xf32>
    %cst_9 = arith.constant dense<0.000000e+00> : vector<128xf32>
    %17 = vector.multi_reduction <add>, %16, %cst_9 [0] : vector<64x128xf32> to vector<128xf32>
    %18 = vector.shape_cast %17 : vector<128xf32> to vector<1x128xf32>
    %19 = arith.addf %3, %18 : vector<1x128xf32>
    %20 = vector.shape_cast %12 : vector<64x128xf32> to vector<8x8x128xf32>
    %21 = arith.truncf %20 : vector<8x8x128xf32> to vector<8x8x128xbf16>
    %c0_10 = arith.constant 0 : index
    %c0_11 = arith.constant 0 : index
    %c0_12 = arith.constant 0 : index
    %c0_13 = arith.constant 0 : index
    %c0_14 = arith.constant 0 : index
    %22 = vector.load %arg3[%c0_10, %c0_11, %c0_12, %c0_13, %c0_14] : memref<1x8x2x8x256xbf16, #tpu.memory_space<vmem>>, vector<1x8x1x8x128xbf16>
    %23 = vector.shape_cast %22 : vector<1x8x1x8x128xbf16> to vector<8x8x128xbf16>
    %24 = vector.shape_cast %21 : vector<8x8x128xbf16> to vector<1x8x1x8x128xbf16>
    tpu.vector_store %arg3[%c0_10, %c0_11, %c0_12, %c0_13, %c0_14], %24 {strides = array<i32>} : memref<1x8x2x8x256xbf16, #tpu.memory_space<vmem>>, vector<1x8x1x8x128xbf16>,
    %25 = vector.extract_strided_slice %1 {offsets = [1, 2, 0], sizes = [8, 8, 128], strides = [1, 1, 1]} : vector<10x10x128xbf16> to vector<8x8x128xbf16>
    %26 = vector.extract_strided_slice %1 {offsets = [1, 1, 0], sizes = [8, 8, 128], strides = [1, 1, 1]} : vector<10x10x128xbf16> to vector<8x8x128xbf16>
    %27 = vector.extract_strided_slice %1 {offsets = [0, 2, 0], sizes = [8, 8, 128], strides = [1, 1, 1]} : vector<10x10x128xbf16> to vector<8x8x128xbf16>
    %28 = vector.extract_strided_slice %1 {offsets = [0, 1, 0], sizes = [8, 8, 128], strides = [1, 1, 1]} : vector<10x10x128xbf16> to vector<8x8x128xbf16>
    %29 = tpu.concatenate %25, %26, %27, %28 in 2 : vector<8x8x128xbf16>, vector<8x8x128xbf16>, vector<8x8x128xbf16>, vector<8x8x128xbf16> -> vector<8x8x512xbf16>
    %30 = vector.shape_cast %29 : vector<8x8x512xbf16> to vector<64x512xbf16>
    %c1 = arith.constant 1 : index
    %c0_15 = arith.constant 0 : index
    %c0_16 = arith.constant 0 : index
    %31 = vector.load %arg2[%c1, %c0_15, %c0_16] : memref<4x512x128xbf16, #tpu.memory_space<vmem>>, vector<1x512x128xbf16>
    %32 = vector.shape_cast %31 : vector<1x512x128xbf16> to vector<512x128xbf16>
    %cst_17 = arith.constant dense<0.000000e+00> : vector<64x128xf32>
    %33 = tpu.matmul %30, %32, %cst_17 {dimension_numbers = #tpu.dot_dimension_numbers<[1], [0], [0], [1], [0, 0, 1, 1], [], []>} : vector<64x512xbf16>, vector<512x128xbf16>, vector<64x128xf32> -> vector<64x128xf32>
    %cst_18 = arith.constant dense<0.000000e+00> : vector<128xf32>
    %34 = vector.multi_reduction <add>, %33, %cst_18 [0] : vector<64x128xf32> to vector<128xf32>
    %35 = vector.shape_cast %34 : vector<128xf32> to vector<1x128xf32>
    %36 = arith.addf %15, %35 : vector<1x128xf32>
    %37 = arith.mulf %33, %33 : vector<64x128xf32>
    %cst_19 = arith.constant dense<0.000000e+00> : vector<128xf32>
    %38 = vector.multi_reduction <add>, %37, %cst_19 [0] : vector<64x128xf32> to vector<128xf32>
    %39 = vector.shape_cast %38 : vector<128xf32> to vector<1x128xf32>
    %40 = arith.addf %19, %39 : vector<1x128xf32>
    %41 = vector.shape_cast %33 : vector<64x128xf32> to vector<8x8x128xf32>
    %42 = arith.truncf %41 : vector<8x8x128xf32> to vector<8x8x128xbf16>
    %c0_20 = arith.constant 0 : index
    %c0_21 = arith.constant 0 : index
    %c0_22 = arith.constant 0 : index
    %c0_23 = arith.constant 0 : index
    %c128 = arith.constant 128 : index
    %43 = vector.load %arg3[%c0_20, %c0_21, %c0_22, %c0_23, %c128] : memref<1x8x2x8x256xbf16, #tpu.memory_space<vmem>>, vector<1x8x1x8x128xbf16>
    %44 = vector.shape_cast %43 : vector<1x8x1x8x128xbf16> to vector<8x8x128xbf16>
    %45 = vector.shape_cast %42 : vector<8x8x128xbf16> to vector<1x8x1x8x128xbf16>
    tpu.vector_store %arg3[%c0_20, %c0_21, %c0_22, %c0_23, %c128], %45 {strides = array<i32>} : memref<1x8x2x8x256xbf16, #tpu.memory_space<vmem>>, vector<1x8x1x8x128xbf16>,
    %46 = vector.extract_strided_slice %1 {offsets = [2, 1, 0], sizes = [8, 8, 128], strides = [1, 1, 1]} : vector<10x10x128xbf16> to vector<8x8x128xbf16>
    %47 = vector.extract_strided_slice %1 {offsets = [2, 0, 0], sizes = [8, 8, 128], strides = [1, 1, 1]} : vector<10x10x128xbf16> to vector<8x8x128xbf16>
    %48 = vector.extract_strided_slice %1 {offsets = [1, 1, 0], sizes = [8, 8, 128], strides = [1, 1, 1]} : vector<10x10x128xbf16> to vector<8x8x128xbf16>
    %49 = vector.extract_strided_slice %1 {offsets = [1, 0, 0], sizes = [8, 8, 128], strides = [1, 1, 1]} : vector<10x10x128xbf16> to vector<8x8x128xbf16>
    %50 = tpu.concatenate %46, %47, %48, %49 in 2 : vector<8x8x128xbf16>, vector<8x8x128xbf16>, vector<8x8x128xbf16>, vector<8x8x128xbf16> -> vector<8x8x512xbf16>
    %51 = vector.shape_cast %50 : vector<8x8x512xbf16> to vector<64x512xbf16>
    %c2 = arith.constant 2 : index
    %c0_24 = arith.constant 0 : index
    %c0_25 = arith.constant 0 : index
    %52 = vector.load %arg2[%c2, %c0_24, %c0_25] : memref<4x512x128xbf16, #tpu.memory_space<vmem>>, vector<1x512x128xbf16>
    %53 = vector.shape_cast %52 : vector<1x512x128xbf16> to vector<512x128xbf16>
    %cst_26 = arith.constant dense<0.000000e+00> : vector<64x128xf32>
    %54 = tpu.matmul %51, %53, %cst_26 {dimension_numbers = #tpu.dot_dimension_numbers<[1], [0], [0], [1], [0, 0, 1, 1], [], []>} : vector<64x512xbf16>, vector<512x128xbf16>, vector<64x128xf32> -> vector<64x128xf32>
    %cst_27 = arith.constant dense<0.000000e+00> : vector<128xf32>
    %55 = vector.multi_reduction <add>, %54, %cst_27 [0] : vector<64x128xf32> to vector<128xf32>
    %56 = vector.shape_cast %55 : vector<128xf32> to vector<1x128xf32>
    %57 = arith.addf %36, %56 : vector<1x128xf32>
    %58 = arith.mulf %54, %54 : vector<64x128xf32>
    %cst_28 = arith.constant dense<0.000000e+00> : vector<128xf32>
    %59 = vector.multi_reduction <add>, %58, %cst_28 [0] : vector<64x128xf32> to vector<128xf32>
    %60 = vector.shape_cast %59 : vector<128xf32> to vector<1x128xf32>
    %61 = arith.addf %40, %60 : vector<1x128xf32>
    %62 = vector.shape_cast %54 : vector<64x128xf32> to vector<8x8x128xf32>
    %63 = arith.truncf %62 : vector<8x8x128xf32> to vector<8x8x128xbf16>
    %c0_29 = arith.constant 0 : index
    %c0_30 = arith.constant 0 : index
    %c1_31 = arith.constant 1 : index
    %c0_32 = arith.constant 0 : index
    %c0_33 = arith.constant 0 : index
    %64 = vector.load %arg3[%c0_29, %c0_30, %c1_31, %c0_32, %c0_33] : memref<1x8x2x8x256xbf16, #tpu.memory_space<vmem>>, vector<1x8x1x8x128xbf16>
    %65 = vector.shape_cast %64 : vector<1x8x1x8x128xbf16> to vector<8x8x128xbf16>
    %66 = vector.shape_cast %63 : vector<8x8x128xbf16> to vector<1x8x1x8x128xbf16>
    tpu.vector_store %arg3[%c0_29, %c0_30, %c1_31, %c0_32, %c0_33], %66 {strides = array<i32>} : memref<1x8x2x8x256xbf16, #tpu.memory_space<vmem>>, vector<1x8x1x8x128xbf16>,
    %67 = vector.extract_strided_slice %1 {offsets = [2, 2, 0], sizes = [8, 8, 128], strides = [1, 1, 1]} : vector<10x10x128xbf16> to vector<8x8x128xbf16>
    %68 = vector.extract_strided_slice %1 {offsets = [2, 1, 0], sizes = [8, 8, 128], strides = [1, 1, 1]} : vector<10x10x128xbf16> to vector<8x8x128xbf16>
    %69 = vector.extract_strided_slice %1 {offsets = [1, 2, 0], sizes = [8, 8, 128], strides = [1, 1, 1]} : vector<10x10x128xbf16> to vector<8x8x128xbf16>
    %70 = vector.extract_strided_slice %1 {offsets = [1, 1, 0], sizes = [8, 8, 128], strides = [1, 1, 1]} : vector<10x10x128xbf16> to vector<8x8x128xbf16>
    %71 = tpu.concatenate %67, %68, %69, %70 in 2 : vector<8x8x128xbf16>, vector<8x8x128xbf16>, vector<8x8x128xbf16>, vector<8x8x128xbf16> -> vector<8x8x512xbf16>
    %72 = vector.shape_cast %71 : vector<8x8x512xbf16> to vector<64x512xbf16>
    %c3 = arith.constant 3 : index
    %c0_34 = arith.constant 0 : index
    %c0_35 = arith.constant 0 : index
    %73 = vector.load %arg2[%c3, %c0_34, %c0_35] : memref<4x512x128xbf16, #tpu.memory_space<vmem>>, vector<1x512x128xbf16>
    %74 = vector.shape_cast %73 : vector<1x512x128xbf16> to vector<512x128xbf16>
    %cst_36 = arith.constant dense<0.000000e+00> : vector<64x128xf32>
    %75 = tpu.matmul %72, %74, %cst_36 {dimension_numbers = #tpu.dot_dimension_numbers<[1], [0], [0], [1], [0, 0, 1, 1], [], []>} : vector<64x512xbf16>, vector<512x128xbf16>, vector<64x128xf32> -> vector<64x128xf32>
    %cst_37 = arith.constant dense<0.000000e+00> : vector<128xf32>
    %76 = vector.multi_reduction <add>, %75, %cst_37 [0] : vector<64x128xf32> to vector<128xf32>
    %77 = vector.shape_cast %76 : vector<128xf32> to vector<1x128xf32>
    %78 = arith.addf %57, %77 : vector<1x128xf32>
    %79 = arith.mulf %75, %75 : vector<64x128xf32>
    %cst_38 = arith.constant dense<0.000000e+00> : vector<128xf32>
    %80 = vector.multi_reduction <add>, %79, %cst_38 [0] : vector<64x128xf32> to vector<128xf32>
    %81 = vector.shape_cast %80 : vector<128xf32> to vector<1x128xf32>
    %82 = arith.addf %61, %81 : vector<1x128xf32>
    %83 = vector.shape_cast %75 : vector<64x128xf32> to vector<8x8x128xf32>
    %84 = arith.truncf %83 : vector<8x8x128xf32> to vector<8x8x128xbf16>
    %c0_39 = arith.constant 0 : index
    %c0_40 = arith.constant 0 : index
    %c1_41 = arith.constant 1 : index
    %c0_42 = arith.constant 0 : index
    %c128_43 = arith.constant 128 : index
    %85 = vector.load %arg3[%c0_39, %c0_40, %c1_41, %c0_42, %c128_43] : memref<1x8x2x8x256xbf16, #tpu.memory_space<vmem>>, vector<1x8x1x8x128xbf16>
    %86 = vector.shape_cast %85 : vector<1x8x1x8x128xbf16> to vector<8x8x128xbf16>
    %87 = vector.shape_cast %84 : vector<8x8x128xbf16> to vector<1x8x1x8x128xbf16>
    tpu.vector_store %arg3[%c0_39, %c0_40, %c1_41, %c0_42, %c128_43], %87 {strides = array<i32>} : memref<1x8x2x8x256xbf16, #tpu.memory_space<vmem>>, vector<1x8x1x8x128xbf16>,
    %c0_44 = arith.constant 0 : index
    %c0_45 = arith.constant 0 : index
    %c0_46 = arith.constant 0 : index
    %88 = vector.load %arg4[%c0_44, %c0_45, %c0_46] : memref<1x2x128xf32, #tpu.memory_space<vmem>>, vector<1x1x128xf32>
    %89 = vector.shape_cast %88 : vector<1x1x128xf32> to vector<1x128xf32>
    %90 = vector.shape_cast %78 : vector<1x128xf32> to vector<1x1x128xf32>
    tpu.vector_store %arg4[%c0_44, %c0_45, %c0_46], %90 {strides = array<i32>} : memref<1x2x128xf32, #tpu.memory_space<vmem>>, vector<1x1x128xf32>,
    %c0_47 = arith.constant 0 : index
    %c1_48 = arith.constant 1 : index
    %c0_49 = arith.constant 0 : index
    %91 = vector.load %arg4[%c0_47, %c1_48, %c0_49] : memref<1x2x128xf32, #tpu.memory_space<vmem>>, vector<1x1x128xf32>
    %92 = vector.shape_cast %91 : vector<1x1x128xf32> to vector<1x128xf32>
    %93 = vector.shape_cast %82 : vector<1x128xf32> to vector<1x1x128xf32>
    tpu.vector_store %arg4[%c0_47, %c1_48, %c0_49], %93 {strides = array<i32>} : memref<1x2x128xf32, #tpu.memory_space<vmem>>, vector<1x1x128xf32>,
    return
  }
  func.func @transform_0(%arg0: i32) -> (i32, i32, i32, i32) {
    %c0_i32 = arith.constant 0 : i32
    %c0_i32_0 = arith.constant 0 : i32
    %c0_i32_1 = arith.constant 0 : i32
    %c0_i32_2 = arith.constant 0 : i32
    return %arg0, %c0_i32, %c0_i32_0, %c0_i32_1 : i32, i32, i32, i32
  }
  func.func @transform_1(%arg0: i32) -> (i32, i32, i32) {
    %c0_i32 = arith.constant 0 : i32
    %c0_i32_0 = arith.constant 0 : i32
    %c0_i32_1 = arith.constant 0 : i32
    %c0_i32_2 = arith.constant 0 : i32
    return %c0_i32, %c0_i32_0, %c0_i32_1 : i32, i32, i32
  }
  func.func @transform_2(%arg0: i32) -> (i32, i32, i32, i32, i32) {
    %c0_i32 = arith.constant 0 : i32
    %c0_i32_0 = arith.constant 0 : i32
    %c0_i32_1 = arith.constant 0 : i32
    %c0_i32_2 = arith.constant 0 : i32
    %c0_i32_3 = arith.constant 0 : i32
    return %arg0, %c0_i32, %c0_i32_0, %c0_i32_1, %c0_i32_2 : i32, i32, i32, i32, i32
  }
  func.func @transform_3(%arg0: i32) -> (i32, i32, i32) {
    %c0_i32 = arith.constant 0 : i32
    %c0_i32_0 = arith.constant 0 : i32
    %c0_i32_1 = arith.constant 0 : i32
    return %arg0, %c0_i32, %c0_i32_0 : i32, i32, i32
  }
}

module attributes {stable_mosaic.version = 11 : i64} {
  func.func @_bn_apply_kernel(%arg0: i32, %arg1: memref<256x128xbf16, #tpu.memory_space<vmem>>, %arg2: memref<1x128xf32, #tpu.memory_space<vmem>>, %arg3: memref<1x128xf32, #tpu.memory_space<vmem>>, %arg4: memref<256x128xf32, #tpu.memory_space<vmem>>) attributes {dimension_semantics = [#tpu.dimension_semantics<parallel>], iteration_bounds = array<i64: 2>, scalar_prefetch = 0 : i64, scratch_operands = 0 : i64, tpu.core_type = #tpu.core_type<tc>, window_params = [{transform_indices = @transform_0, window_bounds = array<i64: 256, 128>}, {pipeline_mode = #tpu.pipeline_mode<synchronous>, transform_indices = @transform_1, window_bounds = array<i64: 1, 128>}, {pipeline_mode = #tpu.pipeline_mode<synchronous>, transform_indices = @transform_2, window_bounds = array<i64: 1, 128>}, {transform_indices = @transform_3, window_bounds = array<i64: 256, 128>}]} {
    %c0 = arith.constant 0 : index
    %c0_0 = arith.constant 0 : index
    %0 = vector.load %arg1[%c0, %c0_0] : memref<256x128xbf16, #tpu.memory_space<vmem>>, vector<256x128xbf16>
    %1 = arith.extf %0 : vector<256x128xbf16> to vector<256x128xf32>
    %c0_1 = arith.constant 0 : index
    %c0_2 = arith.constant 0 : index
    %2 = vector.load %arg2[%c0_1, %c0_2] : memref<1x128xf32, #tpu.memory_space<vmem>>, vector<1x128xf32>
    %3 = vector.broadcast %2 : vector<1x128xf32> to vector<256x128xf32>
    %4 = arith.mulf %1, %3 : vector<256x128xf32>
    %c0_3 = arith.constant 0 : index
    %c0_4 = arith.constant 0 : index
    %5 = vector.load %arg3[%c0_3, %c0_4] : memref<1x128xf32, #tpu.memory_space<vmem>>, vector<1x128xf32>
    %6 = vector.broadcast %5 : vector<1x128xf32> to vector<256x128xf32>
    %7 = arith.addf %4, %6 : vector<256x128xf32>
    %c0_5 = arith.constant 0 : index
    %c0_6 = arith.constant 0 : index
    %8 = vector.load %arg4[%c0_5, %c0_6] : memref<256x128xf32, #tpu.memory_space<vmem>>, vector<256x128xf32>
    tpu.vector_store %arg4[%c0_5, %c0_6], %7 {strides = array<i32>} : memref<256x128xf32, #tpu.memory_space<vmem>>, vector<256x128xf32>,
    return
  }
  func.func @transform_0(%arg0: i32) -> (i32, i32) {
    %c0_i32 = arith.constant 0 : i32
    %c0_i32_0 = arith.constant 0 : i32
    return %arg0, %c0_i32 : i32, i32
  }
  func.func @transform_1(%arg0: i32) -> (i32, i32) {
    %c0_i32 = arith.constant 0 : i32
    %c0_i32_0 = arith.constant 0 : i32
    %c0_i32_1 = arith.constant 0 : i32
    return %c0_i32, %c0_i32_0 : i32, i32
  }
  func.func @transform_2(%arg0: i32) -> (i32, i32) {
    %c0_i32 = arith.constant 0 : i32
    %c0_i32_0 = arith.constant 0 : i32
    %c0_i32_1 = arith.constant 0 : i32
    return %c0_i32, %c0_i32_0 : i32, i32
  }
  func.func @transform_3(%arg0: i32) -> (i32, i32) {
    %c0_i32 = arith.constant 0 : i32
    %c0_i32_0 = arith.constant 0 : i32
    return %arg0, %c0_i32 : i32, i32
  }
}

</mosaic_0001>

<bundles_post_ra>
// kernel: unet_skip_block_innermost.3
= control target key start
LH: loop header
LB: loop body
LE: loop exit
PB: predicated region body
PF: predicated region fallthrough
CT: control target
= control target key end

     0   :  { %s827_s9 = smov 0   ;;  %s993_s0 = inlined_call_operand.vmem [shape: bf16[2,9,9,16], index: 0, kind: input, shape index: {}]   ;;  %s994_s1 = inlined_call_operand.vmem [shape: bf16[64,128], index: 1, kind: input, shape index: {}]   ;;  %s995_s2 = inlined_call_operand.vmem [shape: bf16[2,64,128], index: 2, kind: output, shape index: {}]  }
   0x1 LB: > { %s674_s10 = sadd.s32 4294967295, %s807_s9   ;;  %p678_p0 = scmp.ge.s32.totalorder %s807_s9, 1  ;;  %s807_s9 = sphi %s827_s9, %s12_s9  }
   0x2   : > { %p112_p1 = scmp.lt.s32.totalorder %s807_s9, 3 }
   0x4   : > { %p113_p2 = pnand %p678_p0, %p112_p1 }
   0x5   : > { %p134_p3 = scmp.lt.s32.totalorder (!%p113_p2), %s674_s10, 1  ;;  %s809_s15 = smov (!%p113_p2), 32  }
   0x6   : > { %116 = sbr.rel (%p113_p2) target bundleno = 397 (0x18d), region = 28  ;;  %s810_s16 = smov (!%p113_p2), 16  }
   0x7   : > { %s811_s25 = smov (!%p113_p2), 48  }
   0xb   : > { %s997_s10 = smov (!%p134_p3, %s674_s10), 1 }
   0xc   : > { %s785_s11 = smul.u32 72, %s997_s10  ;;  %s721_s26 = sshll.u32 %s997_s10, 5 }
   0xd   : > { %s143_s29 = scalar_lea.vmem %s995_s2, %s721_s26 }
   0xe   : > { %s841_s14 = scalar_lea.vmem %s993_s0, %s785_s11 }
   0xf   : > { %v150_v0 = vld [vmem:[%s841_s14 + $0x10] sm:$0xf]  ;;  %v151_v1 = vld [vmem:[%s841_s14 + $0x14] sm:$0x1]  ;;  %v148_v2 = vld [vmem:[%s841_s14 + $0x8] sm:$0xf] }
  0x10   : > { %vm168_vm0 = vcmp.ge.bf16.partialorder %v150_v0, 0  ;;  %vm169_vm1 = vcmp.ge.bf16.partialorder %v151_v1, 0  ;;  %v186_v3 = vmul.bf16 1045249613, %v150_v0  ;;  %v187_v4 = vmul.bf16 1045249613, %v151_v1 }
  0x11   : > { %v149_v5 = vld [vmem:[%s841_s14 + $0xc] sm:$0x1]  ;;  %vm166_vm2 = vcmp.ge.bf16.partialorder %v148_v2, 0  ;;  %v184_v6 = vmul.bf16 1045249613, %v148_v2 }
  0x12   : > { %v847_v7 = vsel %vm168_vm0, %v150_v0, %v186_v3  ;;  %vm167_vm3 = vcmp.ge.bf16.partialorder %v149_v5, 0  ;;  %v185_v8 = vmul.bf16 1045249613, %v149_v5  ;;  %v154_v9 = vld [vmem:[%s841_s14 + $0x20] sm:$0xf]  ;;  %v205_v10 = vsel %vm169_vm1, %v151_v1, %v187_v4 }
  0x13   : > { %v691_v11 = vcombine.low %v847_v7, %v847_v7  ;;  %v852_v12 = vsel %vm166_vm2, %v148_v2, %v184_v6  ;;  %v155_v13 = vld [vmem:[%s841_s14 + $0x24] sm:$0x1]  ;;  %vm172_vm4 = vcmp.ge.bf16.partialorder %v154_v9, 0  ;;  %v146_v14 = vld [vmem:[%s841_s14] sm:$0xf]  ;;  %v863_v22 = vcombine.low %v847_v7, %v205_v10 }
  0x14   : > { %v203_v15 = vsel %vm167_vm3, %v149_v5, %v185_v8  ;;  %v690_v16 = vcombine.low %v852_v12, %v852_v12  ;;  %vm173_vm5 = vcmp.ge.bf16.partialorder %v155_v13, 0  ;;  %v190_v17 = vmul.bf16 1045249613, %v154_v9  ;;  %v147_v18 = vld [vmem:[%s841_s14 + $0x4] sm:$0x1] }
  0x15   : > { %342 = vrot.lane.b32.xlu1 %v691_v11, %s809_s15  ;;  %v683_v19 = vcombine.low %v852_v12, %v203_v15  ;;  %v191_v20 = vmul.bf16 1045249613, %v155_v13  ;;  %vm164_vm6 = vcmp.ge.bf16.partialorder %v146_v14, 0  ;;  %vm165_vm7 = vcmp.ge.bf16.partialorder %v147_v18, 0  ;;  %v156_v21 = vld [vmem:[%s841_s14 + $0x28] sm:$0xf] }
  0x16   : > { %340 = vrot.lane.b32.xlu0 %v690_v16, %s809_s15  ;;  %v867_v23 = vsel %vm172_vm4, %v154_v9, %v190_v17  ;;  %v182_v24 = vmul.bf16 1045249613, %v146_v14  ;;  %v183_v25 = vmul.bf16 1045249613, %v147_v18  ;;  %v157_v26 = vld [vmem:[%s841_s14 + $0x2c] sm:$0x1] }
  0x17   : > { %v209_v27 = vsel %vm173_vm5, %v155_v13, %v191_v20  ;;  %vm174_vm8 = vcmp.ge.bf16.partialorder %v156_v21, 0  ;;  %vm175_vm9 = vcmp.ge.bf16.partialorder %v157_v26, 0  ;;  %v192_v28 = vmul.bf16 1045249613, %v156_v21  ;;  %v152_v29 = vld [vmem:[%s841_s14 + $0x18] sm:$0xf] }
  0x18   : > { %v686_v30 = vcombine.low %v867_v23, %v209_v27  ;;  %v873_v31 = vsel %vm164_vm6, %v146_v14, %v182_v24  ;;  %v201_v32 = vsel %vm165_vm7, %v147_v18, %v183_v25  ;;  %v193_v33 = vmul.bf16 1045249613, %v157_v26  ;;  %v153_v38 = vld [vmem:[%s841_s14 + $0x1c] sm:$0x1]  ;;  %v160_v46 = vld [vmem:[%s841_s14 + $0x38] sm:$0xf] }
  0x19   : > { %v682_v34 = vcombine.low %v873_v31, %v201_v32  ;;  %v876_v35 = vsel %vm174_vm8, %v156_v21, %v192_v28  ;;  %v266_v36 = vshrl.u32 %v683_v19, 16  ;;  %v268_v37 = vshll.u32 %v683_v19, 16  ;;  %v161_v54 = vld [vmem:[%s841_s14 + $0x3c] sm:$0x1]  ;;  %v158_v63 = vld [vmem:[%s841_s14 + $0x30] sm:$0xf] }
  0x1a   : > { %v287_v39 = vshrl.u32 %v686_v30, 16  ;;  %v289_v40 = vshll.u32 %v686_v30, 16  ;;  %v211_v41 = vsel %vm175_vm9, %v157_v26, %v193_v33  ;;  %vm170_vm10 = vcmp.ge.bf16.partialorder %v152_v29, 0  ;;  %v159_v0 = vld [vmem:[%s841_s14 + $0x34] sm:$0x1]  ;;  %v797_v28 = vld [vmem:[%s994_s1 + $0x18] sm:$0xff]  }
  0x1b   : > { %v259_v42 = vshrl.u32 %v682_v34, 16  ;;  %v261_v43 = vshll.u32 %v682_v34, 16  ;;  %v687_v44 = vcombine.low %v876_v35, %v211_v41  ;;  %v270_v45 = vrot.slane %v268_v37, 1  ;;  %v162_v27 = vld [vmem:[%s841_s14 + $0x40] sm:$0xf]  ;;  %761 = vmatprep.subr.bf16.mxu0 %v797_v28  ;;  %777 = vmatprep.subr.bf16.mxu1 %v797_v28  ;;  %v799_v41 = vld [vmem:[%s994_s1 + $0x8] sm:$0xff]  }
  0x1c   : > { %v291_v47 = vrot.slane %v289_v40, 1  ;;  %vm171_vm11 = vcmp.ge.bf16.partialorder %v153_v38, 0  ;;  %v188_v48 = vmul.bf16 1045249613, %v152_v29  ;;  %v189_v49 = vmul.bf16 1045249613, %v153_v38  ;;  %762 = vmatpush3.bf16.msra.mxu0 %v797_v28  ;;  %781 = vmatpush3.bf16.msra.mxu1 %v797_v28 }
  0x1d   : > { %v263_v50 = vrot.slane %v261_v43, 1  ;;  %v294_v51 = vshrl.u32 %v687_v44, 16  ;;  %v296_v52 = vshll.u32 %v687_v44, 16  ;;  %v881_v53 = vor.u32 %v270_v45, %v266_v36  ;;  %v163_v34 = vld [vmem:[%s841_s14 + $0x44] sm:$0x1]  ;;  %v798_v36 = vld [vmem:[%s994_s1 + $0x10] sm:$0xff]  }
  0x1e   : > { %v884_v55 = vor.u32 %v291_v47, %v287_v39  ;;  %v887_v56 = vsel %vm170_vm10, %v152_v29, %v188_v48  ;;  %v207_v57 = vsel %vm171_vm11, %v153_v38, %v189_v49  ;;  %v273_v58 = vshrl.u32 %v863_v22, 16  ;;  %763 = vmatprep.subr.bf16.mxu0 %v798_v36  ;;  %778 = vmatprep.subr.bf16.mxu1 %v798_v36  ;;  %v800_v45 = vld [vmem:[%s994_s1] sm:$0xff]  }
  0x1f   : > { %v264_v59 = vor.u32 %v263_v50, %v259_v42  ;;  %v298_v60 = vrot.slane %v296_v52, 1  ;;  %v685_v61 = vcombine.low %v887_v56, %v207_v57  ;;  %v275_v62 = vshll.u32 %v863_v22, 16 }
  0x20   : > { %322 = vrot.lane.b32.xlu1 %v884_v55, %s810_s16  ;;  %vm178_vm12 = vcmp.ge.bf16.partialorder %v160_v46, 0  ;;  %vm179_vm13 = vcmp.ge.bf16.partialorder %v161_v54, 0  ;;  %v196_v1 = vmul.bf16 1045249613, %v160_v46  ;;  %v197_v2 = vmul.bf16 1045249613, %v161_v54  ;;  %764 = vmatpush3.bf16.msra.mxu0 %v798_v36 }
  0x21   : > { %314 = vrot.lane.b32.xlu0 %v264_v59, %s810_s16  ;;  %v897_v3 = vor.u32 %v298_v60, %v294_v51  ;;  %v280_v4 = vshrl.u32 %v685_v61, 16  ;;  %v282_v5 = vshll.u32 %v685_v61, 16  ;;  %v277_v6 = vrot.slane %v275_v62, 1  ;;  %782 = vmatpush3.bf16.msra.mxu1 %v798_v36 }
  0x22   : > { %v899_v8 = vsel %vm178_vm12, %v160_v46, %v196_v1  ;;  %v215_v9 = vsel %vm179_vm13, %v161_v54, %v197_v2  ;;  %vm176_vm14 = vcmp.ge.bf16.partialorder %v158_v63, 0  ;;  %vm177_vm15 = vcmp.ge.bf16.partialorder %v159_v0, 0  ;;  %765 = vmatprep.subr.bf16.mxu0 %v799_v41  ;;  %779 = vmatprep.subr.bf16.mxu1 %v799_v41 }
  0x23   : > { %v284_v10 = vrot.slane %v282_v5, 1  ;;  %v689_v11 = vcombine.low %v899_v8, %v215_v9  ;;  %v194_v13 = vmul.bf16 1045249613, %v158_v63  ;;  %v278_v14 = vor.u32 %v277_v6, %v273_v58 }
  0x24   : > { %324 = vrot.lane.b32.xlu1 %v897_v3, %s810_s16  ;;  %v195_v15 = vmul.bf16 1045249613, %v159_v0  ;;  %v198_v33 = vmul.bf16 1045249613, %v162_v27  ;;  %vm180_vm0 = vcmp.ge.bf16.partialorder %v162_v27, 0  ;;  %v694_v37 = vcombine.low %v876_v35, %v876_v35  ;;  %766 = vmatpush3.bf16.msra.mxu0 %v799_v41 }
  0x25   : > { %316 = vrot.lane.b32.xlu0 %v881_v53, %s810_s16  ;;  %v906_v16 = vor.u32 %v284_v10, %v280_v4  ;;  %v308_v17 = vshrl.u32 %v689_v11, 16  ;;  %v310_v18 = vshll.u32 %v689_v11, 16  ;;  %v908_v19 = vsel %vm176_vm14, %v158_v63, %v194_v13  ;;  %783 = vmatpush3.bf16.msra.mxu1 %v799_v41 }
  0x26   : > { %v213_v20 = vsel %vm177_vm15, %v159_v0, %v195_v15  ;;  %v695_v30 = vcombine.low %v908_v19, %v908_v19  ;;  %v693_v38 = vcombine.low %v867_v23, %v867_v23  ;;  %v199_v39 = vmul.bf16 1045249613, %v163_v34  ;;  %767 = vmatprep.subr.bf16.mxu0 %v800_v45  ;;  %780 = vmatprep.subr.bf16.mxu1 %v800_v45 }
  0x27   : > { %v312_v21 = vrot.slane %v310_v18, 1  ;;  %v688_v22 = vcombine.low %v908_v19, %v213_v20  ;;  %v216_v40 = vsel %vm180_vm0, %v162_v27, %v198_v33  ;;  %vm181_vm1 = vcmp.ge.bf16.partialorder %v163_v34, 0 }
  0x28   : > { %320 = vrot.lane.b32.xlu1 %v906_v16, %s810_s16  ;;  %v692_v42 = vcombine.low %v887_v56, %v887_v56  ;;  %v697_v43 = vcombine.low %v216_v40, %v216_v40  ;;  %v217_v44 = vsel %vm181_vm1, %v163_v34, %v199_v39  ;;  %v696_v46 = vcombine.low %v899_v8, %v899_v8 }
  0x29   : > { %318 = vrot.lane.b32.xlu0 %v278_v14, %s810_s16  ;;  %v313_v24 = vor.u32 %v312_v21, %v308_v17  ;;  %v301_v25 = vshrl.u32 %v688_v22, 16  ;;  %v303_v26 = vshll.u32 %v688_v22, 16  ;;  %v698_v47 = vcombine.low %v216_v40, %v217_v44  ;;  %768 = vmatpush3.bf16.msra.mxu0 %v800_v45 }
  0x2a   : > { %784 = vmatpush3.bf16.msra.mxu1 %v800_v45  ;;  %vm382_vm2 = vcmask 130048   ;;  %vm424_vm3 = vcmask 392192   ;;  %vm407_vm4 = vcmask 261120   ;;  %vm493_vm5 = vcmask 523264  }
  0x2b   : > { %v305_v29 = vrot.slane %v303_v26, 1  ;;  %v362_v48 = vshll.u32 %v698_v47, 16  ;;  %v360_v49 = vshrl.u32 %v698_v47, 16 }
  0x2c   : > { %328 = vrot.lane.b32.xlu1 %v313_v24, %s810_s16 }
  0x2d   : > { %v306_v32 = vor.u32 %v305_v29, %v301_v25  ;;  %v364_v50 = vrot.slane %v362_v48, 1 }
  0x2f   : > { %326 = vrot.lane.b32.xlu0 %v306_v32, %s810_s16  ;;  %v365_v51 = vor.u32 %v364_v50, %v360_v49 }
  0x30   : > { %350 = vrot.lane.b32.xlu1 %v695_v30, %s809_s15 }
  0x33   : > { %348 = vrot.lane.b32.xlu0 %v694_v37, %s809_s15 }
  0x34   : > { %346 = vrot.lane.b32.xlu1 %v693_v38, %s809_s15 }
  0x37   : > { %344 = vrot.lane.b32.xlu0 %v692_v42, %s809_s15 }
  0x38   : > { %354 = vrot.lane.b32.xlu1 %v697_v43, %s809_s15 }
  0x3b   : > { %352 = vrot.lane.b32.xlu0 %v696_v46, %s809_s15 }
  0x3c   : > { %368 = vrot.lane.b32.xlu1 %v278_v14, %s811_s25 }
  0x3f   : > { %366 = vrot.lane.b32.xlu0 %v881_v53, %s811_s25 }
  0x40   : > { %376 = vrot.lane.b32.xlu1 %v306_v32, %s811_s25 }
  0x43   : > { %374 = vrot.lane.b32.xlu0 %v897_v3, %s811_s25 }
  0x44   : > { %372 = vrot.lane.b32.xlu1 %v884_v55, %s811_s25 }
  0x47   : > { %370 = vrot.lane.b32.xlu0 %v906_v16, %s811_s25 }
  0x48   : > { %380 = vrot.lane.b32.xlu1 %v365_v51, %s811_s25 }
  0x4b   : > { %378 = vrot.lane.b32.xlu0 %v313_v24, %s811_s25 }
  0x87   : > { %v343_v52 = vpop.permute.xlu1 %342 }
  0x88   : > { %v341_v54 = vpop.permute.xlu0 %340 }
  0x92   : > { %v323_v57 = vpop.permute.xlu1 %322 }
  0x93   : > { %v315_v58 = vpop.permute.xlu0 %314 }
  0x94   : > { %v385_v6 = vsel %vm382_vm2, %v873_v31, %v315_v58  ;;  %v397_v31 = vsel %vm382_vm2, %v867_v23, %v323_v57 }
  0x95   : > { %v409_v13 = vsel %vm407_vm4, %v385_v6, %v341_v54 }
  0x96   : > { %v325_v59 = vpop.permute.xlu1 %324 }
  0x97   : > { %v317_v60 = vpop.permute.xlu0 %316  ;;  %v400_v15 = vsel %vm382_vm2, %v876_v35, %v325_v59 }
  0x98   : > { %v388_v4 = vsel %vm382_vm2, %v852_v12, %v317_v60 }
  0x99   : > { %v411_v10 = vsel %vm407_vm4, %v388_v4, %v343_v52 }
  0x9a   : > { %v321_v61 = vpop.permute.xlu1 %320 }
  0x9b   : > { %v319_v53 = vpop.permute.xlu0 %318  ;;  %v394_v35 = vsel %vm382_vm2, %v887_v56, %v321_v61 }
  0x9c   : > { %v391_v28 = vsel %vm382_vm2, %v847_v7, %v319_v53 }
  0x9e   : > { %v329_v62 = vpop.permute.xlu1 %328 }
  0x9f   : > { %v406_v56 = vsel %vm382_vm2, %v899_v8, %v329_v62 }
  0xa1   : > { %v327_v63 = vpop.permute.xlu0 %326 }
  0xa2   : > { %v351_v0 = vpop.permute.xlu1 %350  ;;  %v403_v7 = vsel %vm382_vm2, %v908_v19, %v327_v63 }
  0xa3   : > { %v419_v17 = vsel %vm407_vm4, %v400_v15, %v351_v0 }
  0xa5   : > { %v349_v1 = vpop.permute.xlu0 %348 }
  0xa6   : > { %v347_v2 = vpop.permute.xlu1 %346  ;;  %v417_v21 = vsel %vm407_vm4, %v397_v31, %v349_v1 }
  0xa7   : > { %v415_v26 = vsel %vm407_vm4, %v394_v35, %v347_v2 }
  0xa9   : > { %v345_v3 = vpop.permute.xlu0 %344 }
  0xaa   : > { %v355_v55 = vpop.permute.xlu1 %354  ;;  %v413_v29 = vsel %vm407_vm4, %v391_v28, %v345_v3 }
  0xab   : > { %v423_v34 = vsel %vm407_vm4, %v406_v56, %v355_v55 }
  0xad   : > { %v353_v5 = vpop.permute.xlu0 %352 }
  0xae   : > { %v369_v9 = vpop.permute.xlu1 %368  ;;  %v421_v38 = vsel %vm407_vm4, %v403_v7, %v353_v5 }
  0xaf   : > { %v428_v11 = vsel %vm424_vm3, %v411_v10, %v369_v9 }
  0xb1   : > { %v367_v14 = vpop.permute.xlu0 %366 }
  0xb2   : > { %v426_v16 = vsel %vm424_vm3, %v409_v13, %v367_v14  ;;  %v377_v12 = vpop.permute.xlu1 %376 }
  0xb3   : > { %v699_v18 = vcombine.low %v426_v16, %v428_v11  ;;  %v436_v20 = vsel %vm424_vm3, %v419_v17, %v377_v12 }
  0xb5   : > { %769 = vmatprep.mubr.msk.bf16.mxu0 %vm493_vm5, %v699_v18  ;;  %v375_v22 = vpop.permute.xlu0 %374 }
  0xb6   : > { %v434_v24 = vsel %vm424_vm3, %v417_v21, %v375_v22  ;;  %v373_v25 = vpop.permute.xlu1 %372 }
  0xb7   : > { %v701_v27 = vcombine.low %v434_v24, %v436_v20  ;;  %v432_v23 = vsel %vm424_vm3, %v415_v26, %v373_v25 }
  0xb9   : > { %773 = vmatprep.mubr.msk.bf16.mxu1 %vm493_vm5, %v701_v27  ;;  %v371_v30 = vpop.permute.xlu0 %370 }
  0xba   : > { %v430_v32 = vsel %vm424_vm3, %v413_v29, %v371_v30  ;;  %v381_v33 = vpop.permute.xlu1 %380 }
  0xbb   : > { %v700_v36 = vcombine.low %v430_v32, %v432_v23  ;;  %v440_v37 = vsel %vm424_vm3, %v423_v34, %v381_v33 }
  0xbd   : > { %770 = vmatmul.mubr.msk.bf16.vlgmr.msra.gmra.mxu0 %vm493_vm5, %v700_v36  ;;  %v379_v39 = vpop.permute.xlu0 %378 }
  0xbe   : > { %v438_v40 = vsel %vm424_vm3, %v421_v38, %v379_v39 }
  0xbf   : > { %v702_v41 = vcombine.low %v438_v40, %v440_v37 }
  0xc1   : > { %774 = vmatmul.mubr.msk.bf16.vlgmr.msra.gmra.mxu1 %vm493_vm5, %v702_v41 }
 0x17d   : > { %v771_v8 = vpop.f32.mrf.mxu0 }
 0x17e   : > { %v573_v45 = vmax.f32 %v771_v8, 0.0 }
 0x17f   : > { %v540_v42 = vpop.f32.mrf.mxu0 }
 0x180   : > { %v571_v48 = vmax.f32 %v540_v42, 0.0 }
 0x181   : > { %v772_v43 = vpop.f32.mrf.mxu0  ;;  %v775_v44 = vpop.f32.mrf.mxu1 }
 0x182   : > { %v574_v46 = vmax.f32 %v772_v43, 0.0  ;;  %v577_v52 = vmax.f32 %v775_v44, 0.0 }
 0x183   : > { %v543_v19 = vpop.f32.mrf.mxu0  ;;  %v556_v47 = vpop.f32.mrf.mxu1 }
 0x184   : > { %v738_v49 = vpack.c.bf16 %v574_v46, %v573_v45  ;;  %v572_v50 = vmax.f32 %v543_v19, 0.0  ;;  %v575_v59 = vmax.f32 %v556_v47, 0.0 }
 0x185   : > { %v776_v51 = vpop.f32.mrf.mxu1 }
 0x186   : > { %750 = vst [vmem:[%s143_s29 + $0x8] sm:$0xff] %v738_v49   ;;  %v733_v54 = vpack.c.bf16 %v572_v50, %v571_v48  ;;  %v578_v57 = vmax.f32 %v776_v51, 0.0 }
 0x187   : > { %v559_v58 = vpop.f32.mrf.mxu1 }
 0x188   : > { %734 = vst [vmem:[%s143_s29] sm:$0xff] %v733_v54   ;;  %v748_v60 = vpack.c.bf16 %v578_v57, %v577_v52  ;;  %v576_v61 = vmax.f32 %v559_v58, 0.0 }
 0x18a   : > { %752 = vst [vmem:[%s143_s29 + $0x18] sm:$0xff] %v748_v60   ;;  %v743_v53 = vpack.c.bf16 %v576_v61, %v575_v59 }
 0x18c   : > { %751 = vst [vmem:[%s143_s29 + $0x10] sm:$0xff] %v743_v53  }
 0x18d PF: > { %s12_s9 = sadd.s32 1, %s807_s9  }
 0x18e   : > { %p9_p4 = scmp.ge.s32.totalorder %s12_s9, 4  }
 0x190   :  { %11 = sbr.rel (!%p9_p4) target bundleno = 1 (0x1), region = 58 }

// kernel: unet_skip_block_innermost.5
= control target key start
LH: loop header
LB: loop body
LE: loop exit
PB: predicated region body
PF: predicated region fallthrough
CT: control target
= control target key end

     0   :  { %s532_s12 = smov 0   ;;  %s675_s0 = inlined_call_operand.vmem [shape: bf16[512,128], index: 0, kind: input, shape index: {}]   ;;  %s676_s1 = inlined_call_operand.vmem [shape: f32[1,128], index: 1, kind: input, shape index: {}]   ;;  %s677_s2 = inlined_call_operand.vmem [shape: f32[1,128], index: 2, kind: input, shape index: {}]   ;;  %s678_s3 = inlined_call_operand.vmem [shape: f32[512,128], index: 3, kind: output, shape index: {}]  }
   0x1 LB: > { %s404_s13 = sadd.s32 4294967295, %s510_s12   ;;  %p408_p0 = scmp.ge.s32.totalorder %s510_s12, 1  ;;  %s510_s12 = sphi %s532_s12, %s13_s12  }
   0x2   : > { %p138_p1 = scmp.lt.s32.totalorder %s510_s12, 3 }
   0x4   : > { %p139_p2 = pnand %p408_p0, %p138_p1 }
   0x5   : > { %s409_s14 = sshll.u32 (!%p139_p2), %s404_s13, 5 }
   0x6   : > { %142 = sbr.rel (%p139_p2) target bundleno = 43 (0x2b), region = 32  ;;  %p163_p3 = scmp.lt.s32.totalorder (!%p139_p2), %s409_s14, 63 }
   0xb   : > { %s680_s14 = smov (!%p163_p3, %s409_s14), 63  ;;  %v548_v0 = vld [vmem:[%s676_s1] ss:$0 sm:$0xff] }
   0xc   : > { %s410_s15 = sshll.u32 %s680_s14, 2  ;;  %s412_s21 = sshll.u32 %s680_s14, 3  ;;  %v557_v9 = vld [vmem:[%s677_s2] ss:$0 sm:$0xff] }
   0xd   : > { %s543_s18 = scalar_lea.vmem %s675_s0, %s410_s15  ;;  %s566_s26 = scalar_lea.vmem %s678_s3, %s412_s21 }
   0xe   : > { %v418_v1 = vld [vmem:[%s543_s18] sm:$0xff]   ;;  %v481_v2 = vld [vmem:[%s543_s18 + $0x8] sm:$0xff]   ;;  %v482_v3 = vld [vmem:[%s543_s18 + $0x10] sm:$0xff]  }
   0xf   : > { %v419_v4 = vunpack.c.l.bf16 %v418_v1  ;;  %v420_v5 = vunpack.c.h.bf16 %v418_v1  ;;  %v423_v6 = vunpack.c.l.bf16 %v481_v2  ;;  %v424_v7 = vunpack.c.h.bf16 %v481_v2  ;;  %v483_v8 = vld [vmem:[%s543_s18 + $0x18] sm:$0xff]   ;;  %v484_v22 = vld [vmem:[%s543_s18 + $0x20] sm:$0xff]   ;;  %v485_v23 = vld [vmem:[%s543_s18 + $0x28] sm:$0xff]  }
  0x10   : > { %v427_v10 = vunpack.c.l.bf16 %v482_v3  ;;  %v428_v11 = vunpack.c.h.bf16 %v482_v3  ;;  %v431_v12 = vunpack.c.l.bf16 %v483_v8  ;;  %v432_v13 = vunpack.c.h.bf16 %v483_v8  ;;  %v486_v28 = vld [vmem:[%s543_s18 + $0x30] sm:$0xff]   ;;  %v487_v29 = vld [vmem:[%s543_s18 + $0x38] sm:$0xff]   ;;  %v488_v50 = vld [vmem:[%s543_s18 + $0x40] sm:$0xff]  }
  0x11   : > { %v245_v14 = vmul.f32 %v419_v4, %v548_v0  ;;  %v246_v15 = vmul.f32 %v420_v5, %v548_v0  ;;  %v247_v16 = vmul.f32 %v423_v6, %v548_v0  ;;  %v248_v17 = vmul.f32 %v424_v7, %v548_v0  ;;  %v489_v51 = vld [vmem:[%s543_s18 + $0x48] sm:$0xff]   ;;  %v490_v56 = vld [vmem:[%s543_s18 + $0x50] sm:$0xff]   ;;  %v491_v57 = vld [vmem:[%s543_s18 + $0x58] sm:$0xff]  }
  0x12   : > { %v249_v18 = vmul.f32 %v427_v10, %v548_v0  ;;  %v250_v19 = vmul.f32 %v428_v11, %v548_v0  ;;  %v251_v20 = vmul.f32 %v431_v12, %v548_v0  ;;  %v252_v21 = vmul.f32 %v432_v13, %v548_v0 }
  0x13   : > { %v284_v24 = vadd.f32 %v557_v9, %v245_v14  ;;  %v285_v25 = vadd.f32 %v557_v9, %v246_v15  ;;  %v286_v26 = vadd.f32 %v557_v9, %v247_v16  ;;  %v287_v27 = vadd.f32 %v557_v9, %v248_v17  ;;  %v492_v16 = vld [vmem:[%s543_s18 + $0x60] sm:$0xff]   ;;  %v493_v17 = vld [vmem:[%s543_s18 + $0x68] sm:$0xff]  }
  0x14   : > { %v288_v30 = vadd.f32 %v557_v9, %v249_v18  ;;  %v289_v31 = vadd.f32 %v557_v9, %v250_v19  ;;  %v290_v32 = vadd.f32 %v557_v9, %v251_v20  ;;  %v291_v33 = vadd.f32 %v557_v9, %v252_v21 }
  0x15   : > { %316 = vst [vmem:[%s566_s26] sm:$0xff] %v284_v24  ;;  %317 = vst [vmem:[%s566_s26 + $0x8] sm:$0xff] %v285_v25  ;;  %v435_v34 = vunpack.c.l.bf16 %v484_v22  ;;  %v436_v35 = vunpack.c.h.bf16 %v484_v22  ;;  %v439_v36 = vunpack.c.l.bf16 %v485_v23  ;;  %v440_v37 = vunpack.c.h.bf16 %v485_v23  ;;  %v494_v22 = vld [vmem:[%s543_s18 + $0x70] sm:$0xff]   ;;  %v495_v23 = vld [vmem:[%s543_s18 + $0x78] sm:$0xff]  }
  0x16   : > { %318 = vst [vmem:[%s566_s26 + $0x10] sm:$0xff] %v286_v26  ;;  %319 = vst [vmem:[%s566_s26 + $0x18] sm:$0xff] %v287_v27  ;;  %v443_v38 = vunpack.c.l.bf16 %v486_v28  ;;  %v444_v39 = vunpack.c.h.bf16 %v486_v28  ;;  %v447_v40 = vunpack.c.l.bf16 %v487_v29  ;;  %v448_v41 = vunpack.c.h.bf16 %v487_v29 }
  0x17   : > { %320 = vst [vmem:[%s566_s26 + $0x20] sm:$0xff] %v288_v30  ;;  %321 = vst [vmem:[%s566_s26 + $0x28] sm:$0xff] %v289_v31  ;;  %v253_v42 = vmul.f32 %v435_v34, %v548_v0  ;;  %v254_v43 = vmul.f32 %v436_v35, %v548_v0  ;;  %v255_v44 = vmul.f32 %v439_v36, %v548_v0  ;;  %v451_v62 = vunpack.c.l.bf16 %v488_v50 }
  0x18   : > { %322 = vst [vmem:[%s566_s26 + $0x30] sm:$0xff] %v290_v32  ;;  %323 = vst [vmem:[%s566_s26 + $0x38] sm:$0xff] %v291_v33  ;;  %v256_v45 = vmul.f32 %v440_v37, %v548_v0  ;;  %v257_v46 = vmul.f32 %v443_v38, %v548_v0  ;;  %v258_v47 = vmul.f32 %v444_v39, %v548_v0  ;;  %v452_v63 = vunpack.c.h.bf16 %v488_v50 }
  0x19   : > { %v259_v48 = vmul.f32 %v447_v40, %v548_v0  ;;  %v260_v49 = vmul.f32 %v448_v41, %v548_v0  ;;  %v292_v52 = vadd.f32 %v557_v9, %v253_v42  ;;  %v293_v53 = vadd.f32 %v557_v9, %v254_v43 }
  0x1a   : > { %v294_v54 = vadd.f32 %v557_v9, %v255_v44  ;;  %v295_v55 = vadd.f32 %v557_v9, %v256_v45  ;;  %v296_v58 = vadd.f32 %v557_v9, %v257_v46  ;;  %v297_v59 = vadd.f32 %v557_v9, %v258_v47 }
  0x1b   : > { %v298_v60 = vadd.f32 %v557_v9, %v259_v48  ;;  %v299_v61 = vadd.f32 %v557_v9, %v260_v49  ;;  %324 = vst [vmem:[%s566_s26 + $0x40] sm:$0xff] %v292_v52  ;;  %325 = vst [vmem:[%s566_s26 + $0x48] sm:$0xff] %v293_v53  ;;  %v455_v1 = vunpack.c.l.bf16 %v489_v51  ;;  %v456_v2 = vunpack.c.h.bf16 %v489_v51 }
  0x1c   : > { %326 = vst [vmem:[%s566_s26 + $0x50] sm:$0xff] %v294_v54  ;;  %327 = vst [vmem:[%s566_s26 + $0x58] sm:$0xff] %v295_v55  ;;  %v459_v3 = vunpack.c.l.bf16 %v490_v56  ;;  %v460_v4 = vunpack.c.h.bf16 %v490_v56  ;;  %v463_v5 = vunpack.c.l.bf16 %v491_v57  ;;  %v464_v6 = vunpack.c.h.bf16 %v491_v57 }
  0x1d   : > { %328 = vst [vmem:[%s566_s26 + $0x60] sm:$0xff] %v296_v58  ;;  %329 = vst [vmem:[%s566_s26 + $0x68] sm:$0xff] %v297_v59  ;;  %v261_v7 = vmul.f32 %v451_v62, %v548_v0  ;;  %v262_v8 = vmul.f32 %v452_v63, %v548_v0  ;;  %v263_v10 = vmul.f32 %v455_v1, %v548_v0  ;;  %v467_v28 = vunpack.c.l.bf16 %v492_v16 }
  0x1e   : > { %330 = vst [vmem:[%s566_s26 + $0x70] sm:$0xff] %v298_v60  ;;  %331 = vst [vmem:[%s566_s26 + $0x78] sm:$0xff] %v299_v61  ;;  %v264_v11 = vmul.f32 %v456_v2, %v548_v0  ;;  %v265_v12 = vmul.f32 %v459_v3, %v548_v0  ;;  %v266_v13 = vmul.f32 %v460_v4, %v548_v0  ;;  %v468_v29 = vunpack.c.h.bf16 %v492_v16 }
  0x1f   : > { %v267_v14 = vmul.f32 %v463_v5, %v548_v0  ;;  %v268_v15 = vmul.f32 %v464_v6, %v548_v0  ;;  %v300_v18 = vadd.f32 %v557_v9, %v261_v7  ;;  %v301_v19 = vadd.f32 %v557_v9, %v262_v8 }
  0x20   : > { %v302_v20 = vadd.f32 %v557_v9, %v263_v10  ;;  %v303_v21 = vadd.f32 %v557_v9, %v264_v11  ;;  %v304_v24 = vadd.f32 %v557_v9, %v265_v12  ;;  %v305_v25 = vadd.f32 %v557_v9, %v266_v13 }
  0x21   : > { %v306_v26 = vadd.f32 %v557_v9, %v267_v14  ;;  %v307_v27 = vadd.f32 %v557_v9, %v268_v15  ;;  %332 = vst [vmem:[%s566_s26 + $0x80] sm:$0xff] %v300_v18  ;;  %333 = vst [vmem:[%s566_s26 + $0x88] sm:$0xff] %v301_v19  ;;  %v471_v30 = vunpack.c.l.bf16 %v493_v17  ;;  %v472_v31 = vunpack.c.h.bf16 %v493_v17 }
  0x22   : > { %334 = vst [vmem:[%s566_s26 + $0x90] sm:$0xff] %v302_v20  ;;  %335 = vst [vmem:[%s566_s26 + $0x98] sm:$0xff] %v303_v21  ;;  %v475_v32 = vunpack.c.l.bf16 %v494_v22  ;;  %v476_v33 = vunpack.c.h.bf16 %v494_v22  ;;  %v479_v34 = vunpack.c.l.bf16 %v495_v23  ;;  %v480_v35 = vunpack.c.h.bf16 %v495_v23 }
  0x23   : > { %336 = vst [vmem:[%s566_s26 + $0xa0] sm:$0xff] %v304_v24  ;;  %337 = vst [vmem:[%s566_s26 + $0xa8] sm:$0xff] %v305_v25  ;;  %v269_v36 = vmul.f32 %v467_v28, %v548_v0  ;;  %v270_v37 = vmul.f32 %v468_v29, %v548_v0  ;;  %v271_v38 = vmul.f32 %v471_v30, %v548_v0 }
  0x24   : > { %338 = vst [vmem:[%s566_s26 + $0xb0] sm:$0xff] %v306_v26  ;;  %339 = vst [vmem:[%s566_s26 + $0xb8] sm:$0xff] %v307_v27  ;;  %v272_v39 = vmul.f32 %v472_v31, %v548_v0  ;;  %v273_v40 = vmul.f32 %v475_v32, %v548_v0  ;;  %v274_v41 = vmul.f32 %v476_v33, %v548_v0 }
  0x25   : > { %v275_v42 = vmul.f32 %v479_v34, %v548_v0  ;;  %v276_v43 = vmul.f32 %v480_v35, %v548_v0  ;;  %v308_v44 = vadd.f32 %v557_v9, %v269_v36  ;;  %v309_v45 = vadd.f32 %v557_v9, %v270_v37 }
  0x26   : > { %v310_v46 = vadd.f32 %v557_v9, %v271_v38  ;;  %v311_v47 = vadd.f32 %v557_v9, %v272_v39  ;;  %v312_v48 = vadd.f32 %v557_v9, %v273_v40  ;;  %v313_v49 = vadd.f32 %v557_v9, %v274_v41 }
  0x27   : > { %v314_v50 = vadd.f32 %v557_v9, %v275_v42  ;;  %v315_v51 = vadd.f32 %v557_v9, %v276_v43  ;;  %340 = vst [vmem:[%s566_s26 + $0xc0] sm:$0xff] %v308_v44  ;;  %341 = vst [vmem:[%s566_s26 + $0xc8] sm:$0xff] %v309_v45 }
  0x28   : > { %342 = vst [vmem:[%s566_s26 + $0xd0] sm:$0xff] %v310_v46  ;;  %343 = vst [vmem:[%s566_s26 + $0xd8] sm:$0xff] %v311_v47 }
  0x29   : > { %344 = vst [vmem:[%s566_s26 + $0xe0] sm:$0xff] %v312_v48  ;;  %345 = vst [vmem:[%s566_s26 + $0xe8] sm:$0xff] %v313_v49 }
  0x2a   : > { %346 = vst [vmem:[%s566_s26 + $0xf0] sm:$0xff] %v314_v50  ;;  %347 = vst [vmem:[%s566_s26 + $0xf8] sm:$0xff] %v315_v51 }
  0x2b PF: > { %s13_s12 = sadd.s32 1, %s510_s12  }
  0x2c   : > { %p10_p4 = scmp.ge.s32.totalorder %s13_s12, 4  }
  0x2e   :  { %12 = sbr.rel (!%p10_p4) target bundleno = 1 (0x1), region = 62 }

// kernel: unet_skip_block_innermost.4
= control target key start
LH: loop header
LB: loop body
LE: loop exit
PB: predicated region body
PF: predicated region fallthrough
CT: control target
= control target key end

     0   :  { %s3564_s12 = smov 0   ;;  %s4495_s0 = inlined_call_operand.vmem [shape: bf16[2,10,10,128], index: 0, kind: input, shape index: {}]   ;;  %s4496_s1 = inlined_call_operand.vmem [shape: bf16[4,512,128], index: 1, kind: input, shape index: {}]   ;;  %s4497_s2 = inlined_call_operand.vmem [shape: bf16[2,8,2,8,256], index: 2, kind: output, shape index: {0}]   ;;  %s4498_s3 = inlined_call_operand.vmem [shape: f32[2,2,128], index: 3, kind: output, shape index: {1}]  }
   0x1 LB: > { %s2625_s13 = sadd.s32 4294967295, %s3542_s12   ;;  %p2629_p0 = scmp.ge.s32.totalorder %s3542_s12, 1  ;;  %s3542_s12 = sphi %s3564_s12, %s14_s12  }
   0x2   : > { %p140_p1 = scmp.lt.s32.totalorder %s3542_s12, 3 }
   0x4   : > { %p141_p2 = pnand %p2629_p0, %p140_p1 }
   0x5   : > { %p168_p3 = scmp.lt.s32.totalorder (!%p141_p2), %s2625_s13, 1 }
   0x6   : > { %144 = sbr.rel (%p141_p2) target bundleno = 408 (0x198), region = 28 }
   0xb   : > { %v3388_v0 = vld [vmem:[%s4496_s1 + $0x78] sm:$0xff]   ;;  %v3392_v4 = vld [vmem:[%s4496_s1 + $0x70] sm:$0xff]   ;;  %v3396_v8 = vld [vmem:[%s4496_s1 + $0x68] sm:$0xff]   ;;  %s4506_s13 = smov (!%p168_p3, %s2625_s13), 1  ;;  %vm347_vm0 = vsmask.f32 3328 }
   0xc   : > { %v3389_v1 = vld [vmem:[%s4496_s1 + $0xf8] sm:$0xff]   ;;  %3059 = vmatprep.subr.bf16.mxu0 %v3388_v0  ;;  %v3393_v5 = vld [vmem:[%s4496_s1 + $0xf0] sm:$0xff]   ;;  %v3397_v9 = vld [vmem:[%s4496_s1 + $0xe8] sm:$0xff]   ;;  %s3379_s16 = smul.u32 80, %s4506_s13  ;;  %vm348_vm1 = vsmask.f32 7440 }
   0xd   : > { %v3390_v2 = vld [vmem:[%s4496_s1 + $0x38] sm:$0xff]   ;;  %3099 = vmatprep.subr.bf16.mxu1 %v3389_v1  ;;  %v3394_v6 = vld [vmem:[%s4496_s1 + $0x30] sm:$0xff]   ;;  %v3398_v10 = vld [vmem:[%s4496_s1 + $0x28] sm:$0xff]   ;;  %vm1072_vm3 = vcmask 1042432   ;;  %vm1073_vm4 = vcmask 1046532   ;;  %s3058_s4 = sshll.u32 %s4506_s13, 7 }
   0xe   : > { %v3391_v3 = vld [vmem:[%s4496_s1 + $0xb8] sm:$0xff]   ;;  %3060 = vmatpush3.bf16.msra.mxu0 %v3390_v2  ;;  %v3395_v7 = vld [vmem:[%s4496_s1 + $0xb0] sm:$0xff]   ;;  %v3399_v11 = vld [vmem:[%s4496_s1 + $0xa8] sm:$0xff]   ;;  %s3672_s27 = scalar_lea.vmem %s4495_s0, %s3379_s16  ;;  %s4391_s6 = scalar_lea.vmem %s4497_s2, %s3058_s4 }
   0xf   : > { %3100 = vmatpush3.bf16.msra.mxu1 %v3391_v3  ;;  %3061 = vmatprep.subr.bf16.mxu0 %v3392_v4  ;;  %v3400_v12 = vld [vmem:[%s4496_s1 + $0x60] sm:$0xff]   ;;  %v3404_v16 = vld [vmem:[%s4496_s1 + $0x58] sm:$0xff]   ;;  %v3408_v20 = vld [vmem:[%s4496_s1 + $0x50] sm:$0xff]   ;;  %s2633_s7 = sshll.u32 %s4506_s13, 1 }
  0x10   : > { %3101 = vmatprep.subr.bf16.mxu1 %v3393_v5  ;;  %v3401_v13 = vld [vmem:[%s4496_s1 + $0xe0] sm:$0xff]   ;;  %v3405_v17 = vld [vmem:[%s4496_s1 + $0xd8] sm:$0xff]   ;;  %v3409_v21 = vld [vmem:[%s4496_s1 + $0xd0] sm:$0xff]   ;;  %s181_s10 = scalar_lea.vmem %s4498_s3, %s2633_s7 }
  0x11   : > { %v3402_v14 = vld [vmem:[%s4496_s1 + $0x20] sm:$0xff]   ;;  %v3406_v18 = vld [vmem:[%s4496_s1 + $0x18] sm:$0xff]   ;;  %v3410_v22 = vld [vmem:[%s4496_s1 + $0x10] sm:$0xff]  }
  0x12   : > { %3062 = vmatpush3.bf16.msra.mxu0 %v3394_v6  ;;  %v3403_v15 = vld [vmem:[%s4496_s1 + $0xa0] sm:$0xff]   ;;  %v3407_v19 = vld [vmem:[%s4496_s1 + $0x98] sm:$0xff]   ;;  %v3411_v23 = vld [vmem:[%s4496_s1 + $0x90] sm:$0xff]  }
  0x13   : > { %3102 = vmatpush3.bf16.msra.mxu1 %v3395_v7  ;;  %3063 = vmatprep.subr.bf16.mxu0 %v3396_v8  ;;  %v3412_v24 = vld [vmem:[%s4496_s1 + $0x48] sm:$0xff]   ;;  %v3416_v28 = vld [vmem:[%s4496_s1 + $0x40] sm:$0xff]   ;;  %v3684_v33 = vld [vmem:[%s3672_s27 + $0x10] sm:$0xf] }
  0x14   : > { %3103 = vmatprep.subr.bf16.mxu1 %v3397_v9  ;;  %v3413_v25 = vld [vmem:[%s4496_s1 + $0xc8] sm:$0xff]   ;;  %v3417_v29 = vld [vmem:[%s4496_s1 + $0xc0] sm:$0xff]   ;;  %v2635_v35 = vcombine.low %v3684_v33, %v3684_v33  ;;  %v3697_v38 = vld [vmem:[%s3672_s27 + $0x14] sm:$0x1] }
  0x15   : > { %v3414_v26 = vld [vmem:[%s4496_s1 + $0x8] sm:$0xff]   ;;  %v3418_v30 = vld [vmem:[%s4496_s1] sm:$0xff]   ;;  %v3426_v46 = vld [vmem:[%s4496_s1 + $0x178] sm:$0xff]   ;;  %v3717_v51 = vcombine.low %v3684_v33, %v3697_v38  ;;  %v222_v55 = vunpack.c.l.b16 %v3697_v38 }
  0x16   : > { %3064 = vmatpush3.bf16.msra.mxu0 %v3398_v10  ;;  %v3415_v27 = vld [vmem:[%s4496_s1 + $0x88] sm:$0xff]   ;;  %v3419_v31 = vld [vmem:[%s4496_s1 + $0x80] sm:$0xff]   ;;  %v251_v41 = vshrl.u32 %v2635_v35, 16  ;;  %v254_v42 = vshll.u32 %v2635_v35, 16  ;;  %v3427_v47 = vld [vmem:[%s4496_s1 + $0x1f8] sm:$0xff]  }
  0x17   : > { %3104 = vmatpush3.bf16.msra.mxu1 %v3399_v11  ;;  %3065 = vmatprep.subr.bf16.mxu0 %v3400_v12  ;;  %v3681_v32 = vld [vmem:[%s3672_s27 + $0x8] sm:$0xf]  ;;  %v3691_v36 = vld [vmem:[%s3672_s27] sm:$0xf]  ;;  %v3694_v37 = vld [vmem:[%s3672_s27 + $0xc] sm:$0x1] }
  0x18   : > { %3105 = vmatprep.subr.bf16.mxu1 %v3401_v13  ;;  %v2634_v34 = vcombine.low %v3681_v32, %v3681_v32  ;;  %v3700_v43 = vld [vmem:[%s3672_s27 + $0x4] sm:$0x1]  ;;  %v3704_v44 = vcombine.low %v3681_v32, %v3694_v37  ;;  %v2642_v45 = vcombine.low %v3691_v36, %v3691_v36  ;;  %v220_v48 = vunpack.c.l.b16 %v3694_v37  ;;  %vm3745_vm2 = vmor %vm347_vm0, %vm348_vm1 }
  0x19   : > { %v253_v50 = vrot.slane %v251_v41, 7  ;;  %v3721_v54 = vcombine.low %v3691_v36, %v3700_v43  ;;  %v980_v0 = vshrl.u32 %v3717_v51, 16  ;;  %v302_v1 = vunpack.c.l.b16 %v3700_v43  ;;  %vm3986_vm5 = vmor %vm1072_vm3, %vm1073_vm4 }
  0x1a   : > { %3066 = vmatpush3.bf16.msra.mxu0 %v3402_v14  ;;  %v244_v39 = vshrl.u32 %v2634_v34, 16  ;;  %v247_v40 = vshll.u32 %v2634_v34, 16  ;;  %v305_v52 = vshrl.u32 %v2642_v45, 16  ;;  %v308_v53 = vshll.u32 %v2642_v45, 16 }
  0x1b   : > { %3106 = vmatpush3.bf16.msra.mxu1 %v3403_v15  ;;  %3067 = vmatprep.subr.bf16.mxu0 %v3404_v16  ;;  %v256_v57 = vor.u32 %v254_v42, %v253_v50  ;;  %v973_v58 = vshrl.u32 %v3704_v44, 16  ;;  %v1030_v3 = vshrl.u32 %v3721_v54, 16 }
  0x1c   : > { %3107 = vmatprep.subr.bf16.mxu1 %v3405_v17  ;;  %v246_v49 = vrot.slane %v244_v39, 7  ;;  %v307_v59 = vrot.slane %v305_v52, 7  ;;  %v3766_v52 = vld [vmem:[%s3672_s27 + $0x24] sm:$0x1] }
  0x1d   : > { %v316_v61 = vunpack.c.h.b16 %v256_v57  ;;  %v2645_v63 = vcombine.low %v3684_v33, %v256_v57 }
  0x1e   : > { %3068 = vmatpush3.bf16.msra.mxu0 %v3406_v18  ;;  %v249_v56 = vor.u32 %v247_v40, %v246_v49  ;;  %v310_v2 = vor.u32 %v308_v53, %v307_v59  ;;  %v3752_v40 = vld [vmem:[%s3672_s27 + $0x1c] sm:$0x1] }
  0x1f   : > { %3108 = vmatpush3.bf16.msra.mxu1 %v3407_v19  ;;  %3069 = vmatprep.subr.bf16.mxu0 %v3408_v20  ;;  %v334_v5 = vpack.c.b16 %v316_v61, %v222_v55  ;;  %v379_v8 = vshrl.u32 %v2645_v63, 16  ;;  %v382_v9 = vshll.u32 %v2645_v63, 16  ;;  %v3738_v20 = vld [vmem:[%s3672_s27 + $0x18] sm:$0xf] }
  0x20   : > { %3109 = vmatprep.subr.bf16.mxu1 %v3409_v21  ;;  %v313_v60 = vunpack.c.h.b16 %v249_v56  ;;  %v2643_v62 = vcombine.low %v3681_v32, %v249_v56  ;;  %v314_v10 = vunpack.c.h.b16 %v310_v2  ;;  %v2644_v11 = vcombine.low %v3691_v36, %v310_v2 }
  0x21   : > { %v388_v15 = vshll.u32 %v334_v5, 16  ;;  %v381_v16 = vrot.slane %v379_v8, 4  ;;  %v384_v17 = vrot.slane %v382_v9, 5  ;;  %v2636_v34 = vcombine.low %v3738_v20, %v3738_v20  ;;  %v3429_v5 = vld [vmem:[%s4496_s1 + $0x1b8] sm:$0xff]  }
  0x22   : > { %3070 = vmatpush3.bf16.msra.mxu0 %v3410_v22  ;;  %v331_v4 = vpack.c.b16 %v313_v60, %v220_v48  ;;  %v351_v6 = vshrl.u32 %v2643_v62, 16  ;;  %v354_v7 = vshll.u32 %v2643_v62, 16  ;;  %v332_v18 = vpack.c.b16 %v314_v10, %v302_v1  ;;  %v3430_v62 = vld [vmem:[%s4496_s1 + $0x170] sm:$0xff]  }
  0x23   : > { %3110 = vmatpush3.bf16.msra.mxu1 %v3411_v23  ;;  %3071 = vmatprep.subr.bf16.mxu0 %v3412_v24  ;;  %v365_v19 = vshrl.u32 %v2644_v11, 16  ;;  %v390_v23 = vrot.slane %v388_v15, 5  ;;  %v368_v24 = vshll.u32 %v2644_v11, 16  ;;  %v261_v49 = vshll.u32 %v2636_v34, 16  ;;  %v3431_v10 = vld [vmem:[%s4496_s1 + $0x1f0] sm:$0xff]  }
  0x24   : > { %3111 = vmatprep.subr.bf16.mxu1 %v3413_v25  ;;  %v353_v12 = vrot.slane %v351_v6, 4  ;;  %v356_v13 = vrot.slane %v354_v7, 5  ;;  %v360_v14 = vshll.u32 %v331_v4, 16  ;;  %v3741_v25 = vld [vmem:[%s3672_s27 + $0x20] sm:$0xf]  ;;  %v1033_v4 = vshll.u32 %v3721_v54, 16 }
  0x25   : > { %v2637_v41 = vcombine.low %v3741_v25, %v3741_v25  ;;  %v224_v6 = vunpack.c.l.b16 %v3752_v40  ;;  %v226_v11 = vunpack.c.l.b16 %v3766_v52  ;;  %v3432_v15 = vld [vmem:[%s4496_s1 + $0x130] sm:$0xff]  }
  0x26   : > { %3072 = vmatpush3.bf16.msra.mxu0 %v3414_v26  ;;  %v357_v21 = vor.u32 %v356_v13, %v353_v12  ;;  %v362_v22 = vrot.slane %v360_v14, 5  ;;  %v3791_v13 = vld [vmem:[%s3672_s27 + $0x28] sm:$0xf]  ;;  %v3793_v14 = vrot.slane %v1030_v3, 7  ;;  %v3433_v3 = vld [vmem:[%s4496_s1 + $0x1b0] sm:$0xff]  }
  0x27   : > { %3112 = vmatpush3.bf16.msra.mxu1 %v3415_v27  ;;  %3073 = vmatprep.subr.bf16.mxu0 %v3416_v28  ;;  %v385_v27 = vor.u32 %v384_v17, %v381_v16  ;;  %v367_v28 = vrot.slane %v365_v19, 4  ;;  %v265_v53 = vshrl.u32 %v2637_v41, 16  ;;  %v268_v56 = vshll.u32 %v2637_v41, 16  ;;  %v3803_v19 = vld [vmem:[%s3672_s27 + $0x30] sm:$0xf] }
  0x28   : > { %3113 = vmatprep.subr.bf16.mxu1 %v3417_v29  ;;  %v374_v29 = vshll.u32 %v332_v18, 16  ;;  %v3438_v18 = vld [vmem:[%s4496_s1 + $0x168] sm:$0xff]  }
  0x29   : > { %v386_v35 = vrot.slane %v385_v27, 4  ;;  %v267_v63 = vrot.slane %v265_v53, 7  ;;  %v976_v27 = vshll.u32 %v3704_v44, 16 }
  0x2a   : > { %3074 = vmatpush3.bf16.msra.mxu0 %v3418_v30  ;;  %v358_v30 = vrot.slane %v357_v21, 4  ;;  %v376_v39 = vrot.slane %v374_v29, 5  ;;  %v2638_v21 = vcombine.low %v3791_v13, %v3791_v13 }
  0x2b   : > { %3114 = vmatpush3.bf16.msra.mxu1 %v3419_v31  ;;  %3139 = vmatprep.subr.bf16.mxu0 %v3426_v46  ;;  %v370_v31 = vrot.slane %v368_v24, 5  ;;  %v3428_v46 = vld [vmem:[%s4496_s1 + $0x138] sm:$0xff]   ;;  %v3763_v50 = vsel %vm3745_vm2, %v386_v35, %v390_v23  ;;  %v270_v12 = vor.u32 %v268_v56, %v267_v63  ;;  %v975_v24 = vrot.slane %v973_v58, 7  ;;  %v3823_v35 = vld [vmem:[%s3672_s27 + $0x2c] sm:$0x1] }
  0x2c   : > { %3179 = vmatprep.subr.bf16.mxu1 %v3427_v47  ;;  %v363_v42 = vsel %vm3745_vm2, %v358_v30, %v362_v22  ;;  %v258_v47 = vshrl.u32 %v2636_v34, 16  ;;  %v3440_v34 = vld [vmem:[%s4496_s1 + $0x128] sm:$0xff]   ;;  %v2639_v58 = vcombine.low %v3803_v19, %v3803_v19  ;;  %v275_v53 = vshll.u32 %v2638_v21, 16  ;;  %v3836_v63 = vld [vmem:[%s3672_s27 + $0x34] sm:$0x1] }
  0x2d   : > { %v371_v45 = vor.u32 %v370_v31, %v367_v28  ;;  %v3769_v57 = vcombine.high %v363_v42, %v3763_v50  ;;  %v3772_v60 = vcombine.low %v363_v42, %v3763_v50  ;;  %v320_v22 = vunpack.c.h.b16 %v270_v12  ;;  %v3439_v31 = vld [vmem:[%s4496_s1 + $0x1e8] sm:$0xff]  }
  0x2e   : > { %v260_v61 = vrot.slane %v258_v47, 7  ;;  %v2647_v23 = vcombine.low %v3741_v25, %v270_v12 }
  0x2f   : > { %v372_v59 = vrot.slane %v371_v45, 4  ;;  %814 = vmatprep.mubr.bf16.mxu0 %v3769_v57  ;;  %v338_v44 = vpack.c.b16 %v320_v22, %v226_v11  ;;  %v272_v45 = vshrl.u32 %v2638_v21, 16  ;;  %v3847_v22 = vcombine.low %v3738_v20, %v3752_v40  ;;  %v3476_v40 = vld [vmem:[%s4496_s1 + $0x230] sm:$0xff]  }
  0x30   : > { %v263_v7 = vor.u32 %v261_v49, %v260_v61  ;;  %815 = vmatmul.mubr.bf16.vlgmr.msra.gmra.mxu0 %v3772_v60  ;;  %v410_v41 = vshll.u32 %v2647_v23, 16 }
  0x31   : > { %v377_v2 = vsel %vm3745_vm2, %v372_v59, %v376_v39  ;;  %3140 = vmatpush3.bf16.msra.mxu0 %v3428_v46  ;;  %v407_v39 = vshrl.u32 %v2647_v23, 16  ;;  %v416_v61 = vshll.u32 %v338_v44, 16 }
  0x32   : > { %v2654_v8 = vcombine.low %v377_v2, %v363_v42  ;;  %v2655_v9 = vcombine.high %v377_v2, %v363_v42  ;;  %v318_v16 = vunpack.c.h.b16 %v263_v7  ;;  %v2646_v17 = vcombine.low %v3738_v20, %v263_v7  ;;  %3141 = vmatprep.subr.bf16.mxu0 %v3430_v62  ;;  %v3442_v42 = vld [vmem:[%s4496_s1 + $0x160] sm:$0xff]   ;;  %v3441_v62 = vld [vmem:[%s4496_s1 + $0x1a8] sm:$0xff]  }
  0x33   : > { %v409_v56 = vrot.slane %v407_v39, 4  ;;  %v412_v59 = vrot.slane %v410_v41, 5  ;;  %v274_v2 = vrot.slane %v272_v45, 7  ;;  %v3861_v39 = vor.u32 %v976_v27, %v975_v24  ;;  %v3451_v24 = vld [vmem:[%s4496_s1 + $0x1d8] sm:$0xff]  }
  0x34   : > { %879 = vmatprep.mubr.bf16.mxu1 %v2655_v9  ;;  %v336_v28 = vpack.c.b16 %v318_v16, %v224_v6  ;;  %v393_v29 = vshrl.u32 %v2646_v17, 16  ;;  %v396_v30 = vshll.u32 %v2646_v17, 16  ;;  %v279_v9 = vshrl.u32 %v2639_v58, 16  ;;  %v3444_v16 = vld [vmem:[%s4496_s1 + $0x120] sm:$0xff]   ;;  %v3452_v27 = vld [vmem:[%s4496_s1 + $0x118] sm:$0xff]  }
  0x35   : > { %880 = vmatmul.mubr.bf16.vlgmr.msra.gmra.mxu1 %v2654_v8  ;;  %3142 = vmatpush3.bf16.msra.mxu0 %v3432_v15  ;;  %v3443_v8 = vld [vmem:[%s4496_s1 + $0x1e0] sm:$0xff]   ;;  %v413_v12 = vor.u32 %v412_v59, %v409_v56  ;;  %v418_v15 = vrot.slane %v416_v61, 5  ;;  %v228_v17 = vunpack.c.l.b16 %v3823_v35 }
  0x36   : > { %3180 = vmatpush3.bf16.msra.mxu1 %v3429_v5  ;;  %v395_v46 = vrot.slane %v393_v29, 4  ;;  %v398_v47 = vrot.slane %v396_v30, 5  ;;  %v402_v49 = vshll.u32 %v336_v28, 16  ;;  %3143 = vmatprep.subr.bf16.mxu0 %v3438_v18  ;;  %v277_v18 = vor.u32 %v275_v53, %v274_v2  ;;  %v3450_v30 = vld [vmem:[%s4496_s1 + $0x158] sm:$0xff]   ;;  %v3895_v53 = vld [vmem:[%s3672_s27 + $0x40] sm:$0xf] }
  0x37   : > { %3181 = vmatprep.subr.bf16.mxu1 %v3431_v10  ;;  %v282_v10 = vshll.u32 %v2639_v58, 16  ;;  %v281_v23 = vrot.slane %v279_v9, 7  ;;  %v414_v28 = vrot.slane %v413_v12, 4  ;;  %v3856_v58 = vor.u32 %v1033_v4, %v3793_v14  ;;  %v3445_v4 = vld [vmem:[%s4496_s1 + $0x1a0] sm:$0xff]   ;;  %v3454_v2 = vld [vmem:[%s4496_s1 + $0x150] sm:$0xff]  }
  0x38   : > { %v399_v5 = vor.u32 %v398_v47, %v395_v46  ;;  %v404_v7 = vrot.slane %v402_v49, 5  ;;  %v2648_v29 = vcombine.low %v3791_v13, %v277_v18  ;;  %v3892_v49 = vld [vmem:[%s3672_s27 + $0x38] sm:$0xf]  ;;  %v3913_v12 = vld [vmem:[%s3672_s27 + $0x3c] sm:$0x1] }
  0x39   : > { %3144 = vmatpush3.bf16.msra.mxu0 %v3440_v34  ;;  %v284_v34 = vor.u32 %v282_v10, %v281_v23  ;;  %v3865_v41 = vsel %vm3745_vm2, %v414_v28, %v418_v15  ;;  %v3455_v10 = vld [vmem:[%s4496_s1 + $0x1d0] sm:$0xff]   ;;  %v1038_v15 = vunpack.c.h.b16 %v3861_v39  ;;  %v3921_v28 = vld [vmem:[%s3672_s27 + $0x44] sm:$0x1] }
  0x3a   : > { %3182 = vmatpush3.bf16.msra.mxu1 %v3433_v3  ;;  %v400_v21 = vrot.slane %v399_v5, 4  ;;  %3145 = vmatprep.subr.bf16.mxu0 %v3442_v42  ;;  %v322_v3 = vunpack.c.h.b16 %v277_v18  ;;  %v421_v56 = vshrl.u32 %v2648_v29, 16  ;;  %v424_v59 = vshll.u32 %v2648_v29, 16  ;;  %v3456_v23 = vld [vmem:[%s4496_s1 + $0x110] sm:$0xff]  }
  0x3b   : > { %3183 = vmatprep.subr.bf16.mxu1 %v3439_v31  ;;  %v4499_v31 = vunpack.c.l.b16 %v3836_v63  ;;  %v324_v46 = vunpack.c.h.b16 %v284_v34  ;;  %v2649_v47 = vcombine.low %v3803_v19, %v284_v34  ;;  %v1039_v5 = vunpack.c.h.b16 %v3856_v58 }
  0x3c   : > { %v405_v44 = vsel %vm3745_vm2, %v400_v21, %v404_v7  ;;  %v340_v14 = vpack.c.b16 %v322_v3, %v228_v17  ;;  %v426_v18 = vrot.slane %v424_v59, 5  ;;  %v2640_v3 = vcombine.low %v3892_v49, %v3892_v49 }
  0x3d   : > { %v3868_v42 = vcombine.high %v3763_v50, %v405_v44  ;;  %v3871_v54 = vcombine.low %v3763_v50, %v405_v44  ;;  %v3885_v45 = vcombine.high %v405_v44, %v3865_v41  ;;  %v3888_v50 = vcombine.low %v405_v44, %v3865_v41  ;;  %3146 = vmatpush3.bf16.msra.mxu0 %v3444_v16 }
  0x3e   : > { %3184 = vmatpush3.bf16.msra.mxu1 %v3441_v62  ;;  %v430_v61 = vshll.u32 %v340_v14, 16  ;;  %3147 = vmatprep.subr.bf16.mxu0 %v3450_v30  ;;  %v3453_v62 = vld [vmem:[%s4496_s1 + $0x198] sm:$0xff]   ;;  %v342_v7 = vpack.c.b16 %v324_v46, %v4499_v31  ;;  %v438_v9 = vshll.u32 %v2649_v47, 16  ;;  %v423_v16 = vrot.slane %v421_v56, 4 }
  0x3f   : > { %3185 = vmatprep.subr.bf16.mxu1 %v3443_v8  ;;  %887 = vmatprep.mubr.bf16.mxu1 %v3868_v42  ;;  %v435_v8 = vshrl.u32 %v2649_v47, 16  ;;  %v2641_v34 = vcombine.low %v3895_v53, %v3895_v53  ;;  %v286_v46 = vshrl.u32 %v2640_v3, 16  ;;  %v289_v47 = vshll.u32 %v2640_v3, 16 }
  0x40   : > { %822 = vmatprep.mubr.bf16.mxu0 %v3885_v45  ;;  %888 = vmatmul.mubr.bf16.gmra.mxu1 %v3871_v54  ;;  %v432_v21 = vrot.slane %v430_v61, 5  ;;  %v440_v30 = vrot.slane %v438_v9, 5  ;;  %v444_v44 = vshll.u32 %v342_v7, 16  ;;  %v427_v14 = vor.u32 %v426_v18, %v423_v16 }
  0x41   : > { %823 = vmatmul.mubr.bf16.gmra.mxu0 %v3888_v50  ;;  %v437_v29 = vrot.slane %v435_v8, 4  ;;  %v2710_v56 = vcombine.low %v3691_v36, %v3856_v58  ;;  %v293_v8 = vshrl.u32 %v2641_v34, 16  ;;  %v296_v7 = vshll.u32 %v2641_v34, 16  ;;  %v3464_v34 = vld [vmem:[%s4496_s1 + $0x108] sm:$0xff]  }
  0x42   : > { %3186 = vmatpush3.bf16.msra.mxu1 %v3445_v4  ;;  %3148 = vmatpush3.bf16.msra.mxu0 %v3452_v27  ;;  %v3462_v4 = vld [vmem:[%s4496_s1 + $0x148] sm:$0xff]   ;;  %v446_v61 = vrot.slane %v444_v44, 5  ;;  %v3457_v27 = vld [vmem:[%s4496_s1 + $0x190] sm:$0xff]   ;;  %v232_v9 = vunpack.c.l.b16 %v3913_v12  ;;  %v288_v31 = vrot.slane %v286_v46, 7  ;;  %v2709_v16 = vcombine.low %v3681_v32, %v3861_v39 }
  0x43   : > { %3187 = vmatprep.subr.bf16.mxu1 %v3451_v24  ;;  %3149 = vmatprep.subr.bf16.mxu0 %v3454_v2  ;;  %v441_v59 = vor.u32 %v440_v30, %v437_v29  ;;  %v428_v24 = vrot.slane %v427_v14, 4  ;;  %v3463_v2 = vld [vmem:[%s4496_s1 + $0x1c8] sm:$0xff]   ;;  %v234_v3 = vunpack.c.l.b16 %v3921_v28  ;;  %v1056_v29 = vpack.c.b16 %v1038_v15, %v220_v48 }
  0x44   : > { %v291_v44 = vor.u32 %v289_v47, %v288_v31  ;;  %v3465_v32 = vld [vmem:[%s4496_s1 + $0x188] sm:$0xff]   ;;  %v982_v39 = vrot.slane %v980_v0, 7  ;;  %v3956_v37 = vpack.c.b16 %v1039_v5, %v302_v1  ;;  %v983_v14 = vshll.u32 %v3717_v51, 16 }
  0x45   : > { %v442_v18 = vrot.slane %v441_v59, 4  ;;  %v433_v30 = vsel %vm3745_vm2, %v428_v24, %v432_v21  ;;  %v3466_v21 = vld [vmem:[%s4496_s1 + $0x140] sm:$0xff]   ;;  %v2718_v47 = vrot.slane %v2709_v16, 9  ;;  %v987_v58 = vshrl.u32 %v3847_v22, 16 }
  0x46   : > { %3188 = vmatpush3.bf16.msra.mxu1 %v3453_v62  ;;  %3150 = vmatpush3.bf16.msra.mxu0 %v3456_v23  ;;  %v295_v62 = vrot.slane %v293_v8, 7  ;;  %v3963_v31 = vcombine.high %v3865_v41, %v433_v30  ;;  %v326_v1 = vunpack.c.h.b16 %v291_v44  ;;  %v2650_v5 = vcombine.low %v3892_v49, %v291_v44  ;;  %v3469_v16 = vld [vmem:[%s4496_s1 + $0x180] sm:$0xff]  }
  0x47   : > { %3189 = vmatprep.subr.bf16.mxu1 %v3455_v10  ;;  %3151 = vmatprep.subr.bf16.mxu0 %v3462_v4  ;;  %v3960_v48 = vsel %vm3745_vm2, %v442_v18, %v446_v61  ;;  %v3966_v10 = vcombine.low %v3865_v41, %v433_v30  ;;  %v3467_v41 = vld [vmem:[%s4496_s1 + $0x1c0] sm:$0xff]   ;;  %v985_v18 = vor.u32 %v983_v14, %v982_v39  ;;  %v3471_v39 = vld [vmem:[%s4496_s1 + $0x2f8] sm:$0xff]  }
  0x48   : > { %v298_v15 = vor.u32 %v296_v7, %v295_v62  ;;  %v3972_v0 = vcombine.high %v433_v30, %v3960_v48  ;;  %v3975_v43 = vcombine.low %v433_v30, %v3960_v48  ;;  %895 = vmatprep.mubr.bf16.mxu1 %v3963_v31  ;;  %v344_v59 = vpack.c.b16 %v326_v1, %v232_v9 }
  0x49   : > { %896 = vmatmul.mubr.bf16.gmra.mxu1 %v3966_v10  ;;  %v449_v61 = vshrl.u32 %v2650_v5, 16  ;;  %v452_v8 = vshll.u32 %v2650_v5, 16  ;;  %v1077_v7 = vrot.slane %v1056_v29, 5  ;;  %v2711_v14 = vcombine.low %v3684_v33, %v985_v18 }
  0x4a   : > { %3190 = vmatpush3.bf16.msra.mxu1 %v3457_v27  ;;  %v328_v23 = vunpack.c.h.b16 %v298_v15  ;;  %v2651_v4 = vcombine.low %v3895_v53, %v298_v15  ;;  %830 = vmatprep.mubr.bf16.mxu0 %v3972_v0  ;;  %v458_v44 = vshll.u32 %v344_v59, 16  ;;  %v3470_v15 = vld [vmem:[%s4496_s1 + $0x278] sm:$0xff]  }
  0x4b   : > { %3191 = vmatprep.subr.bf16.mxu1 %v3463_v2  ;;  %831 = vmatmul.mubr.bf16.gmra.mxu0 %v3975_v43  ;;  %v3468_v2 = vld [vmem:[%s4496_s1 + $0x100] sm:$0xff]   ;;  %v451_v62 = vrot.slane %v449_v61, 4  ;;  %v454_v30 = vrot.slane %v452_v8, 5  ;;  %v4005_v29 = vsel %vm3986_vm5, %v2718_v47, %v1077_v7  ;;  %v2719_v47 = vrot.slane %v2710_v56, 9 }
  0x4c   : > { %v346_v51 = vpack.c.b16 %v328_v23, %v234_v3  ;;  %v463_v24 = vshrl.u32 %v2651_v4, 16  ;;  %v466_v27 = vshll.u32 %v2651_v4, 16  ;;  %3152 = vmatpush3.bf16.msra.mxu0 %v3464_v34  ;;  %v1041_v4 = vunpack.c.h.b16 %v985_v18 }
  0x4d   : > { %3153 = vmatprep.subr.bf16.mxu0 %v3466_v21  ;;  %v455_v34 = vor.u32 %v454_v30, %v451_v62  ;;  %v1081_v21 = vrot.slane %v3956_v37, 5  ;;  %v2720_v7 = vrot.slane %v2711_v14, 9 }
  0x4e   : > { %3192 = vmatpush3.bf16.msra.mxu1 %v3465_v32  ;;  %v465_v1 = vrot.slane %v463_v24, 4  ;;  %v468_v5 = vrot.slane %v466_v27, 5  ;;  %v472_v23 = vshll.u32 %v346_v51, 16  ;;  %v460_v32 = vrot.slane %v458_v44, 5 }
  0x4f   : > { %3193 = vmatprep.subr.bf16.mxu1 %v3467_v41  ;;  %v1059_v8 = vpack.c.b16 %v1041_v4, %v222_v55  ;;  %v456_v41 = vrot.slane %v455_v34, 4  ;;  %v2703_v51 = vcombine.low %v3741_v25, %v3766_v52  ;;  %v1082_v36 = vsel %vm3986_vm5, %v2719_v47, %v1081_v21  ;;  %v3473_v21 = vld [vmem:[%s4496_s1 + $0x2b8] sm:$0xff]  }
  0x50   : > { %v469_v59 = vor.u32 %v468_v5, %v465_v1  ;;  %v474_v61 = vrot.slane %v472_v23, 5  ;;  %3154 = vmatpush3.bf16.msra.mxu0 %v3468_v2  ;;  %v2794_v55 = vcombine.high %v1082_v36, %v4005_v29  ;;  %v990_v44 = vshll.u32 %v3847_v22, 16 }
  0x51   : > { %v1085_v33 = vrot.slane %v1059_v8, 5  ;;  %3219 = vmatprep.subr.bf16.mxu0 %v3470_v15  ;;  %v461_v38 = vsel %vm3745_vm2, %v456_v41, %v460_v32  ;;  %v994_v15 = vshrl.u32 %v2703_v51, 16  ;;  %v997_v1 = vshll.u32 %v2703_v51, 16  ;;  %v3472_v8 = vld [vmem:[%s4496_s1 + $0x238] sm:$0xff]  }
  0x52   : > { %3194 = vmatpush3.bf16.msra.mxu1 %v3469_v16  ;;  %v470_v24 = vrot.slane %v469_v59, 4  ;;  %v4033_v37 = vcombine.high %v3960_v48, %v461_v38  ;;  %v4036_v27 = vcombine.low %v3960_v48, %v461_v38  ;;  %v2704_v16 = vcombine.low %v3791_v13, %v3823_v35 }
  0x53   : > { %3259 = vmatprep.subr.bf16.mxu1 %v3471_v39  ;;  %v4040_v2 = vsel %vm3986_vm5, %v2720_v7, %v1085_v33  ;;  %v989_v48 = vrot.slane %v987_v58, 7  ;;  %v2705_v5 = vcombine.low %v3803_v19, %v3836_v63  ;;  %v996_v4 = vrot.slane %v994_v15, 7 }
  0x54   : > { %v4030_v56 = vsel %vm3745_vm2, %v470_v24, %v474_v61  ;;  %v4052_v30 = vcombine.high %v4005_v29, %v4040_v2  ;;  %903 = vmatprep.mubr.bf16.mxu1 %v4033_v37  ;;  %v4063_v39 = vcombine.low %v3892_v49, %v3913_v12  ;;  %v2793_v22 = vcombine.low %v1082_v36, %v4005_v29 }
  0x55   : > { %v4045_v18 = vcombine.high %v461_v38, %v4030_v56  ;;  %v4048_v62 = vcombine.low %v461_v38, %v4030_v56  ;;  %904 = vmatmul.mubr.bf16.gmra.mxu1 %v4036_v27  ;;  %v992_v23 = vor.u32 %v990_v44, %v989_v48  ;;  %v1001_v34 = vshrl.u32 %v2704_v16, 16  ;;  %v3475_v38 = vld [vmem:[%s4496_s1 + $0x2f0] sm:$0xff]  }
  0x56   : > { %1515 = vmatprep.mubr.bf16.mxu1 %v2794_v55  ;;  %v999_v32 = vor.u32 %v997_v1, %v996_v4  ;;  %v1004_v59 = vshll.u32 %v2704_v16, 16  ;;  %v4070_v61 = vcombine.low %v4005_v29, %v4040_v2  ;;  %v1008_v7 = vshrl.u32 %v2705_v5, 16 }
  0x57   : > { %838 = vmatprep.mubr.bf16.mxu0 %v4045_v18  ;;  %v1043_v14 = vunpack.c.h.b16 %v992_v23  ;;  %v2712_v47 = vcombine.low %v3738_v20, %v992_v23  ;;  %v1003_v41 = vrot.slane %v1001_v34, 7  ;;  %v1011_v51 = vshll.u32 %v2705_v5, 16  ;;  %v3474_v20 = vld [vmem:[%s4496_s1 + $0x270] sm:$0xff]  }
  0x58   : > { %839 = vmatmul.mubr.bf16.gmra.mxu0 %v4048_v62  ;;  %v1045_v24 = vunpack.c.h.b16 %v999_v32  ;;  %v2713_v33 = vcombine.low %v3741_v25, %v999_v32  ;;  %v1010_v58 = vrot.slane %v1008_v7, 7  ;;  %v3477_v25 = vld [vmem:[%s4496_s1 + $0x2b0] sm:$0xff]   ;;  %v2707_v5 = vcombine.low %v3895_v53, %v3921_v28 }
  0x59   : > { %1450 = vmatprep.mubr.bf16.mxu0 %v4052_v30  ;;  %v1061_v29 = vpack.c.b16 %v1043_v14, %v224_v6  ;;  %v2721_v36 = vrot.slane %v2712_v47, 9  ;;  %v1006_v55 = vor.u32 %v1004_v59, %v1003_v41  ;;  %v1015_v23 = vshrl.u32 %v4063_v39, 16  ;;  %v3479_v47 = vld [vmem:[%s4496_s1 + $0x2e8] sm:$0xff]   ;;  %v3492_v28 = vld [vmem:[%s4496_s1 + $0x210] sm:$0xff]  }
  0x5a   : > { %v1063_v16 = vpack.c.b16 %v1045_v24, %v226_v11  ;;  %v2722_v44 = vrot.slane %v2713_v33, 9  ;;  %v1013_v6 = vor.u32 %v1011_v51, %v1010_v58  ;;  %v3483_v51 = vld [vmem:[%s4496_s1 + $0x2e0] sm:$0xff]   ;;  %v1022_v33 = vshrl.u32 %v2707_v5, 16 }
  0x5b   : > { %v1089_v48 = vrot.slane %v1061_v29, 5  ;;  %v1047_v15 = vunpack.c.h.b16 %v1006_v55  ;;  %v2714_v1 = vcombine.low %v3791_v13, %v1006_v55  ;;  %v3478_v13 = vld [vmem:[%s4496_s1 + $0x268] sm:$0xff]   ;;  %v1017_v24 = vrot.slane %v1015_v23, 7  ;;  %v3482_v55 = vld [vmem:[%s4496_s1 + $0x260] sm:$0xff]  }
  0x5c   : > { %v1093_v11 = vrot.slane %v1063_v16, 5  ;;  %v2715_v59 = vcombine.low %v3803_v19, %v1013_v6  ;;  %v3481_v19 = vld [vmem:[%s4496_s1 + $0x2a8] sm:$0xff]   ;;  %v1018_v29 = vshll.u32 %v4063_v39, 16  ;;  %v1024_v16 = vrot.slane %v1022_v33, 7  ;;  %v3484_v39 = vld [vmem:[%s4496_s1 + $0x220] sm:$0xff]  }
  0x5d   : > { %1516 = vmatmul.mubr.bf16.vlgmr.msra.gmra.mxu1 %v2793_v22  ;;  %v1090_v52 = vsel %vm3986_vm5, %v2721_v36, %v1089_v48  ;;  %v1049_v22 = vunpack.c.h.b16 %v1013_v6  ;;  %v1065_v34 = vpack.c.b16 %v1047_v15, %v228_v17  ;;  %v3480_v17 = vld [vmem:[%s4496_s1 + $0x228] sm:$0xff]  }
  0x5e   : > { %3260 = vmatpush3.bf16.msra.mxu1 %v3473_v21  ;;  %v4103_v4 = vcombine.high %v4040_v2, %v1090_v52  ;;  %v1094_v32 = vsel %vm3986_vm5, %v2722_v44, %v1093_v11  ;;  %v4113_v14 = vcombine.low %v4040_v2, %v1090_v52  ;;  %v4504_v2 = vunpack.c.l.b16 %v3836_v63 }
  0x5f   : > { %3261 = vmatprep.subr.bf16.mxu1 %v3475_v38  ;;  %v4119_v21 = vcombine.high %v1090_v52, %v1094_v32  ;;  %v4122_v35 = vcombine.low %v1090_v52, %v1094_v32  ;;  %v1097_v7 = vrot.slane %v1065_v34, 5  ;;  %v1025_v38 = vshll.u32 %v2707_v5, 16  ;;  %v3486_v52 = vld [vmem:[%s4496_s1 + $0x258] sm:$0xff]  }
  0x60   : > { %1451 = vmatmul.mubr.bf16.vlgmr.msra.gmra.mxu0 %v4070_v61  ;;  %1523 = vmatprep.mubr.bf16.mxu1 %v4103_v4  ;;  %v1067_v41 = vpack.c.b16 %v1049_v22, %v4504_v2  ;;  %v1020_v58 = vor.u32 %v1018_v29, %v1017_v24  ;;  %v3489_v34 = vld [vmem:[%s4496_s1 + $0x298] sm:$0xff]   ;;  %v3496_v29 = vld [vmem:[%s4496_s1 + $0x208] sm:$0xff]  }
  0x61   : > { %3220 = vmatpush3.bf16.msra.mxu0 %v3472_v8  ;;  %v2723_v8 = vrot.slane %v2714_v1, 9  ;;  %1458 = vmatprep.mubr.bf16.mxu0 %v4119_v21  ;;  %v1027_v6 = vor.u32 %v1025_v38, %v1024_v16  ;;  %v3487_v1 = vld [vmem:[%s4496_s1 + $0x2d8] sm:$0xff]   ;;  %v3498_v38 = vld [vmem:[%s4496_s1 + $0x240] sm:$0xff]  }
  0x62   : > { %3221 = vmatprep.subr.bf16.mxu0 %v3474_v20  ;;  %3262 = vmatpush3.bf16.msra.mxu1 %v3477_v25  ;;  %v2724_v20 = vrot.slane %v2715_v59, 9  ;;  %v1101_v36 = vrot.slane %v1067_v41, 5  ;;  %v1051_v15 = vunpack.c.h.b16 %v1020_v58  ;;  %v2716_v5 = vcombine.low %v3892_v49, %v1020_v58  ;;  %v3488_v49 = vld [vmem:[%s4496_s1 + $0x218] sm:$0xff]   ;;  %v3493_v41 = vld [vmem:[%s4496_s1 + $0x290] sm:$0xff]   ;;  %v3501_v58 = vld [vmem:[%s4496_s1 + $0x280] sm:$0xff]  }
  0x63   : > { %v1098_v63 = vsel %vm3986_vm5, %v2723_v8, %v1097_v7  ;;  %3263 = vmatprep.subr.bf16.mxu1 %v3479_v47  ;;  %v1053_v11 = vunpack.c.h.b16 %v1027_v6  ;;  %v3490_v8 = vld [vmem:[%s4496_s1 + $0x250] sm:$0xff]   ;;  %v3503_v16 = vld [vmem:[%s4496_s1 + $0x3f8] sm:$0xff]  }
  0x64   : > { %v1102_v48 = vsel %vm3986_vm5, %v2724_v20, %v1101_v36  ;;  %v4148_v44 = vcombine.high %v1094_v32, %v1098_v63  ;;  %v1069_v23 = vpack.c.b16 %v1051_v15, %v232_v9  ;;  %v4168_v22 = vcombine.low %v1094_v32, %v1098_v63  ;;  %v3491_v32 = vld [vmem:[%s4496_s1 + $0x2d0] sm:$0xff]   ;;  %v3494_v20 = vld [vmem:[%s4496_s1 + $0x248] sm:$0xff]   ;;  %v3499_v36 = vld [vmem:[%s4496_s1 + $0x2c0] sm:$0xff]  }
  0x65   : > { %3222 = vmatpush3.bf16.msra.mxu0 %v3476_v40  ;;  %1524 = vmatmul.mubr.bf16.gmra.mxu1 %v4113_v14  ;;  %v3485_v40 = vld [vmem:[%s4496_s1 + $0x2a0] sm:$0xff]   ;;  %v4154_v25 = vcombine.high %v1098_v63, %v1102_v48  ;;  %v2725_v47 = vrot.slane %v2716_v5, 9  ;;  %v4176_v59 = vcombine.low %v1098_v63, %v1102_v48  ;;  %v1071_v12 = vpack.c.b16 %v1053_v11, %v234_v3  ;;  %v3497_v63 = vld [vmem:[%s4496_s1 + $0x288] sm:$0xff]   ;;  %v3509_v15 = vld [vmem:[%s4496_s1 + $0x3b0] sm:$0xff]  }
  0x66   : > { %3223 = vmatprep.subr.bf16.mxu0 %v3478_v13  ;;  %3264 = vmatpush3.bf16.msra.mxu1 %v3481_v19  ;;  %v2717_v13 = vcombine.low %v3895_v53, %v1027_v6  ;;  %v1105_v53 = vrot.slane %v1069_v23, 5  ;;  %v3508_v6 = vld [vmem:[%s4496_s1 + $0x330] sm:$0xff]   ;;  %v3513_v5 = vld [vmem:[%s4496_s1 + $0x3a8] sm:$0xff]   ;;  %v3517_v11 = vld [vmem:[%s4496_s1 + $0x3a0] sm:$0xff]  }
  0x67   : > { %3265 = vmatprep.subr.bf16.mxu1 %v3483_v51  ;;  %1531 = vmatprep.mubr.bf16.mxu1 %v4148_v44  ;;  %v1109_v2 = vrot.slane %v1071_v12, 5  ;;  %v3495_v51 = vld [vmem:[%s4496_s1 + $0x2c8] sm:$0xff]  }
  0x68   : > { %1459 = vmatmul.mubr.bf16.gmra.mxu0 %v4122_v35  ;;  %v2726_v9 = vrot.slane %v2717_v13, 9  ;;  %v3516_v13 = vld [vmem:[%s4496_s1 + $0x320] sm:$0xff]   ;;  %v4303_v12 = vld [vmem:[%s3672_s27 + $0x4c] sm:$0x1] }
  0x69   : > { %3224 = vmatpush3.bf16.msra.mxu0 %v3480_v17  ;;  %1466 = vmatprep.mubr.bf16.mxu0 %v4154_v25  ;;  %v1106_v17 = vsel %vm3986_vm5, %v2725_v47, %v1105_v53 }
  0x6a   : > { %3225 = vmatprep.subr.bf16.mxu0 %v3482_v55  ;;  %3266 = vmatpush3.bf16.msra.mxu1 %v3485_v40  ;;  %v4192_v3 = vcombine.high %v1102_v48, %v1106_v17  ;;  %v4200_v7 = vsel %vm3986_vm5, %v2726_v9, %v1109_v2  ;;  %v4213_v24 = vcombine.low %v1102_v48, %v1106_v17  ;;  %v3500_v55 = vld [vmem:[%s4496_s1 + $0x200] sm:$0xff]   ;;  %v3504_v48 = vld [vmem:[%s4496_s1 + $0x338] sm:$0xff]  }
  0x6b   : > { %3267 = vmatprep.subr.bf16.mxu1 %v3487_v1  ;;  %v4203_v19 = vcombine.high %v1106_v17, %v4200_v7  ;;  %v4219_v33 = vcombine.low %v1106_v17, %v4200_v7  ;;  %v3505_v40 = vld [vmem:[%s4496_s1 + $0x3b8] sm:$0xff]   ;;  %v3511_v1 = vld [vmem:[%s4496_s1 + $0x3e8] sm:$0xff]  }
  0x6c   : > { %v3521_v9 = vld [vmem:[%s4496_s1 + $0x398] sm:$0xff]  }
  0x6d   : > { %3226 = vmatpush3.bf16.msra.mxu0 %v3484_v39  ;;  %1532 = vmatmul.mubr.bf16.gmra.mxu1 %v4168_v22  ;;  %v3502_v39 = vld [vmem:[%s4496_s1 + $0x378] sm:$0xff]  }
  0x6e   : > { %3227 = vmatprep.subr.bf16.mxu0 %v3486_v52  ;;  %3268 = vmatpush3.bf16.msra.mxu1 %v3489_v34  ;;  %v4287_v52 = vld [vmem:[%s3672_s27 + $0x48] sm:$0xf] }
  0x6f   : > { %3269 = vmatprep.subr.bf16.mxu1 %v3491_v32  ;;  %1539 = vmatprep.mubr.bf16.mxu1 %v4192_v3  ;;  %v2839_v23 = vcombine.low %v4287_v52, %v4287_v52  ;;  %v1603_v32 = vunpack.c.l.b16 %v4303_v12 }
  0x70   : > { %1467 = vmatmul.mubr.bf16.gmra.mxu0 %v4176_v59 }
  0x71   : > { %3228 = vmatpush3.bf16.msra.mxu0 %v3488_v49  ;;  %1474 = vmatprep.mubr.bf16.mxu0 %v4203_v19  ;;  %v3519_v49 = vld [vmem:[%s4496_s1 + $0x3d8] sm:$0xff]   ;;  %v1606_v34 = vshrl.u32 %v2839_v23, 16  ;;  %v1609_v47 = vshll.u32 %v2839_v23, 16 }
  0x72   : > { %3229 = vmatprep.subr.bf16.mxu0 %v3490_v8  ;;  %3270 = vmatpush3.bf16.msra.mxu1 %v3493_v41 }
  0x73   : > { %3271 = vmatprep.subr.bf16.mxu1 %v3495_v51  ;;  %v1608_v53 = vrot.slane %v1606_v34, 7 }
  0x75   : > { %3230 = vmatpush3.bf16.msra.mxu0 %v3492_v28  ;;  %1540 = vmatmul.mubr.bf16.gmra.mxu1 %v4213_v24  ;;  %v1611_v8 = vor.u32 %v1609_v47, %v1608_v53  ;;  %v3525_v28 = vld [vmem:[%s4496_s1 + $0x390] sm:$0xff]  }
  0x76   : > { %3231 = vmatprep.subr.bf16.mxu0 %v3494_v20  ;;  %3272 = vmatpush3.bf16.msra.mxu1 %v3497_v63 }
  0x77   : > { %3273 = vmatprep.subr.bf16.mxu1 %v3499_v36  ;;  %1990 = vmatprep.mubr.bf16.mxu1 %v3769_v57  ;;  %v3506_v57 = vld [vmem:[%s4496_s1 + $0x370] sm:$0xff]   ;;  %v1613_v17 = vunpack.c.h.b16 %v1611_v8  ;;  %v2840_v2 = vcombine.low %v4287_v52, %v1611_v8 }
  0x78   : > { %1475 = vmatmul.mubr.bf16.gmra.mxu0 %v4219_v33 }
  0x79   : > { %3232 = vmatpush3.bf16.msra.mxu0 %v3496_v29  ;;  %1925 = vmatprep.mubr.bf16.mxu0 %v3868_v42  ;;  %v3507_v42 = vld [vmem:[%s4496_s1 + $0x3f0] sm:$0xff]   ;;  %v1615_v41 = vpack.c.b16 %v1613_v17, %v1603_v32  ;;  %v1617_v51 = vshrl.u32 %v2840_v2, 16  ;;  %v1620_v20 = vshll.u32 %v2840_v2, 16 }
  0x7a   : > { %3233 = vmatprep.subr.bf16.mxu0 %v3498_v38  ;;  %3274 = vmatpush3.bf16.msra.mxu1 %v3501_v58  ;;  %v3524_v29 = vld [vmem:[%s4496_s1 + $0x310] sm:$0xff]   ;;  %v2947_v38 = vcombine.low %v4287_v52, %v4303_v12 }
  0x7b   : > { %3339 = vmatprep.subr.bf16.mxu1 %v3503_v16  ;;  %v1622_v63 = vrot.slane %v1620_v20, 5  ;;  %v1626_v36 = vshll.u32 %v1615_v41, 16 }
  0x7d   : > { %3234 = vmatpush3.bf16.msra.mxu0 %v3500_v55  ;;  %1991 = vmatmul.mubr.bf16.vlgmr.msra.gmra.mxu1 %v3772_v60  ;;  %v3510_v60 = vld [vmem:[%s4496_s1 + $0x368] sm:$0xff]   ;;  %v1628_v16 = vrot.slane %v1626_v36, 5 }
  0x7e   : > { %3299 = vmatprep.subr.bf16.mxu0 %v3502_v39  ;;  %3340 = vmatpush3.bf16.msra.mxu1 %v3505_v40  ;;  %v3528_v55 = vld [vmem:[%s4496_s1 + $0x348] sm:$0xff]  }
  0x7f   : > { %3341 = vmatprep.subr.bf16.mxu1 %v3507_v42  ;;  %1998 = vmatprep.mubr.bf16.mxu1 %v3885_v45  ;;  %v3515_v45 = vld [vmem:[%s4496_s1 + $0x3e0] sm:$0xff]   ;;  %v3531_v39 = vld [vmem:[%s4496_s1 + $0x388] sm:$0xff]  }
  0x80   : > { %1926 = vmatmul.mubr.bf16.vlgmr.msra.gmra.mxu0 %v3871_v54  ;;  %v3512_v54 = vld [vmem:[%s4496_s1 + $0x328] sm:$0xff]   ;;  %v3532_v42 = vld [vmem:[%s4496_s1 + $0x340] sm:$0xff]  }
  0x81   : > { %3300 = vmatpush3.bf16.msra.mxu0 %v3504_v48  ;;  %1933 = vmatprep.mubr.bf16.mxu0 %v3963_v31  ;;  %v3514_v31 = vld [vmem:[%s4496_s1 + $0x360] sm:$0xff]   ;;  %v3530_v48 = vld [vmem:[%s4496_s1 + $0x308] sm:$0xff]  }
  0x82   : > { %3301 = vmatprep.subr.bf16.mxu0 %v3506_v57  ;;  %3342 = vmatpush3.bf16.msra.mxu1 %v3509_v15  ;;  %v2078_v57 = vshrl.u32 %v2947_v38, 16  ;;  %v3535_v15 = vld [vmem:[%s4496_s1 + $0x380] sm:$0xff]  }
  0x83   : > { %3343 = vmatprep.subr.bf16.mxu1 %v3511_v1 }
  0x84   : > { %v2080_v26 = vrot.slane %v2078_v57, 7 }
  0x85   : > { %3302 = vmatpush3.bf16.msra.mxu0 %v3508_v6  ;;  %1999 = vmatmul.mubr.bf16.gmra.mxu1 %v3888_v50  ;;  %v3518_v50 = vld [vmem:[%s4496_s1 + $0x358] sm:$0xff]  }
  0x86   : > { %3303 = vmatprep.subr.bf16.mxu0 %v3510_v60  ;;  %3344 = vmatpush3.bf16.msra.mxu1 %v3513_v5 }
  0x87   : > { %3345 = vmatprep.subr.bf16.mxu1 %v3515_v45  ;;  %2006 = vmatprep.mubr.bf16.mxu1 %v3972_v0  ;;  %v3522_v0 = vld [vmem:[%s4496_s1 + $0x350] sm:$0xff]  }
  0x88   : > { %1934 = vmatmul.mubr.bf16.gmra.mxu0 %v3966_v10  ;;  %v3520_v10 = vld [vmem:[%s4496_s1 + $0x318] sm:$0xff]  }
  0x89   : > { %3304 = vmatpush3.bf16.msra.mxu0 %v3512_v54  ;;  %1941 = vmatprep.mubr.bf16.mxu0 %v4033_v37  ;;  %v3523_v37 = vld [vmem:[%s4496_s1 + $0x3d0] sm:$0xff]   ;;  %v2081_v54 = vshll.u32 %v2947_v38, 16 }
  0x8a   : > { %3305 = vmatprep.subr.bf16.mxu0 %v3514_v31  ;;  %3346 = vmatpush3.bf16.msra.mxu1 %v3517_v11 }
  0x8b   : > { %3347 = vmatprep.subr.bf16.mxu1 %v3519_v49 }
  0x8d   : > { %3306 = vmatpush3.bf16.msra.mxu0 %v3516_v13  ;;  %2007 = vmatmul.mubr.bf16.gmra.mxu1 %v3975_v43  ;;  %v3529_v43 = vld [vmem:[%s4496_s1 + $0x3c8] sm:$0xff]  }
  0x8e   : > { %3307 = vmatprep.subr.bf16.mxu0 %v3518_v50  ;;  %3348 = vmatpush3.bf16.msra.mxu1 %v3521_v9 }
  0x8f   : > { %3349 = vmatprep.subr.bf16.mxu1 %v3523_v37  ;;  %2014 = vmatprep.mubr.bf16.mxu1 %v4045_v18  ;;  %v3533_v18 = vld [vmem:[%s4496_s1 + $0x3c0] sm:$0xff]  }
  0x90   : > { %1942 = vmatmul.mubr.bf16.gmra.mxu0 %v4036_v27  ;;  %v1619_v27 = vrot.slane %v1617_v51, 4 }
  0x91   : > { %3308 = vmatpush3.bf16.msra.mxu0 %v3520_v10 }
  0x92   : > { %3309 = vmatprep.subr.bf16.mxu0 %v3522_v0  ;;  %3350 = vmatpush3.bf16.msra.mxu1 %v3525_v28  ;;  %v1623_v58 = vor.u32 %v1622_v63, %v1619_v27 }
  0x93   : > { %3351 = vmatprep.subr.bf16.mxu1 %v3529_v43 }
  0x94   : > { %v1624_v40 = vrot.slane %v1623_v58, 4 }
  0x95   : > { %3310 = vmatpush3.bf16.msra.mxu0 %v3524_v29  ;;  %2015 = vmatmul.mubr.bf16.gmra.mxu1 %v4048_v62  ;;  %v3534_v62 = vld [vmem:[%s4496_s1 + $0x300] sm:$0xff]  }
  0x96   : > { %3311 = vmatprep.subr.bf16.mxu0 %v3528_v55  ;;  %v1629_v6 = vsel %vm3745_vm2, %v1624_v40, %v1628_v16  ;;  %3352 = vmatpush3.bf16.msra.mxu1 %v3531_v39 }
  0x97   : > { %2452 = vmatprep.mubr.bf16.mxu1 %v4052_v30  ;;  %v2906_v1 = vcombine.high %v4030_v56, %v1629_v6  ;;  %v2905_v60 = vcombine.low %v4030_v56, %v1629_v6  ;;  %3353 = vmatprep.subr.bf16.mxu1 %v3533_v18  ;;  %v2083_v30 = vor.u32 %v2081_v54, %v2080_v26 }
  0x99   : > { %3312 = vmatpush3.bf16.msra.mxu0 %v3530_v48  ;;  %1949 = vmatprep.mubr.bf16.mxu0 %v2906_v1  ;;  %v2085_v56 = vunpack.c.h.b16 %v2083_v30  ;;  %v2948_v5 = vcombine.low %v4287_v52, %v2083_v30 }
  0x9a   : > { %3313 = vmatprep.subr.bf16.mxu0 %v3532_v42  ;;  %1950 = vmatmul.mubr.bf16.gmra.mxu0 %v2905_v60 }
  0x9b   : > { %3354 = vmatpush3.bf16.msra.mxu1 %v3535_v15  ;;  %2387 = vmatprep.mubr.bf16.mxu0 %v4103_v4  ;;  %v2087_v31 = vpack.c.b16 %v2085_v56, %v1603_v32  ;;  %v2949_v4 = vrot.slane %v2948_v5, 9 }
  0x9d   : > { %3314 = vmatpush3.bf16.msra.mxu0 %v3534_v62  ;;  %v2090_v45 = vrot.slane %v2087_v31, 5 }
  0x9e   : > { %2453 = vmatmul.mubr.bf16.vlgmr.msra.gmra.mxu1 %v4070_v61 }
  0x9f   : > { %2460 = vmatprep.mubr.bf16.mxu1 %v4119_v21  ;;  %v2091_v61 = vsel %vm3986_vm5, %v2949_v4, %v2090_v45 }
  0xa0   : > { %v3014_v21 = vcombine.low %v4200_v7, %v2091_v61 }
  0xa2   : > { %2388 = vmatmul.mubr.bf16.vlgmr.msra.gmra.mxu0 %v4113_v14  ;;  %v3015_v14 = vcombine.high %v4200_v7, %v2091_v61 }
  0xa3   : > { %2395 = vmatprep.mubr.bf16.mxu0 %v4148_v44 }
  0xa6   : > { %2461 = vmatmul.mubr.bf16.gmra.mxu1 %v4122_v35 }
  0xa7   : > { %2468 = vmatprep.mubr.bf16.mxu1 %v4154_v25 }
  0xaa   : > { %2396 = vmatmul.mubr.bf16.gmra.mxu0 %v4168_v22 }
  0xab   : > { %2403 = vmatprep.mubr.bf16.mxu0 %v4192_v3 }
  0xae   : > { %2469 = vmatmul.mubr.bf16.gmra.mxu1 %v4176_v59 }
  0xaf   : > { %2476 = vmatprep.mubr.bf16.mxu1 %v4203_v19 }
  0xb2   : > { %2404 = vmatmul.mubr.bf16.gmra.mxu0 %v4213_v24 }
  0xb3   : > { %2411 = vmatprep.mubr.bf16.mxu0 %v3015_v14 }
  0xb6   : > { %2477 = vmatmul.mubr.bf16.gmra.mxu1 %v4219_v33 }
  0xba   : > { %2412 = vmatmul.mubr.bf16.gmra.mxu0 %v3014_v21 }
  0xf0   : > { %v3075_v35 = vpop.f32.mrf.mxu0 }
  0xf2   : > { %v3076_v44 = vpop.f32.mrf.mxu0 }
  0xf3   : > { %v3077_v46 = vadd.f32 %v3076_v44, %v3075_v35 }
  0xf4   : > { %v3078_v22 = vpop.f32.mrf.mxu0 }
  0xf5   : > { %v3115_v25 = vpop.f32.mrf.mxu1 }
  0xf6   : > { %v3079_v52 = vpop.f32.mrf.mxu0 }
  0xf7   : > { %v3116_v3 = vpop.f32.mrf.mxu1  ;;  %v3080_v23 = vadd.f32 %v3079_v52, %v3078_v22 }
  0xf8   : > { %v3117_v59 = vadd.f32 %v3116_v3, %v3115_v25 }
  0xf9   : > { %v3118_v19 = vpop.f32.mrf.mxu1 }
  0xfa   : > { %v882_v11 = vadd.f32 %v3117_v59, %v3077_v46 }
  0xfb   : > { %v3119_v7 = vpop.f32.mrf.mxu1 }
  0xfc   : > { %v948_v24 = vpack.c.bf16 %v882_v11, %v882_v11  ;;  %v3120_v33 = vadd.f32 %v3119_v7, %v3118_v19  ;;  %v926_v49 = vmul.f32 %v882_v11, %v882_v11 }
  0xfe   : > { %956 = vst [vmem:[%s4391_s6] sm:$0xf] %v948_v24  ;;  %v885_v13 = vadd.f32 %v3120_v33, %v3080_v23 }
 0x100   : > { %v912_v34 = vadd.f32 %v885_v13, %v882_v11  ;;  %v927_v47 = vmul.f32 %v885_v13, %v885_v13  ;;  %v949_v12 = vpack.c.bf16 %v885_v13, %v885_v13  ;;  %v3121_v50 = vpop.f32.mrf.mxu1 }
 0x101   : > { %v3081_v10 = vpop.f32.mrf.mxu0 }
 0x102   : > { %v934_v53 = vadd.f32 %v927_v47, %v926_v49  ;;  %957 = vst [vmem:[%s4391_s6 + $0x10] sm:$0xf] %v949_v12  ;;  %v3122_v9 = vpop.f32.mrf.mxu1 }
 0x103   : > { %v3082_v32 = vpop.f32.mrf.mxu0  ;;  %v3123_v8 = vadd.f32 %v3122_v9, %v3121_v50 }
 0x104   : > { %v3083_v37 = vadd.f32 %v3082_v32, %v3081_v10  ;;  %v3124_v0 = vpop.f32.mrf.mxu1 }
 0x105   : > { %v3084_v17 = vpop.f32.mrf.mxu0 }
 0x106   : > { %v890_v2 = vadd.f32 %v3123_v8, %v3083_v37  ;;  %v3125_v28 = vpop.f32.mrf.mxu1 }
 0x107   : > { %v3085_v41 = vpop.f32.mrf.mxu0  ;;  %v3126_v51 = vadd.f32 %v3125_v28, %v3124_v0 }
 0x108   : > { %v913_v20 = vadd.f32 %v912_v34, %v890_v2  ;;  %v928_v29 = vmul.f32 %v890_v2, %v890_v2  ;;  %v950_v43 = vpack.c.bf16 %v890_v2, %v890_v2  ;;  %v3086_v27 = vadd.f32 %v3085_v41, %v3084_v17 }
 0x109   : > { %v3127_v38 = vpop.f32.mrf.mxu1 }
 0x10a   : > { %v935_v63 = vadd.f32 %v934_v53, %v928_v29  ;;  %958 = vst [vmem:[%s4391_s6 + $0x20] sm:$0xf] %v950_v43  ;;  %v893_v36 = vadd.f32 %v3126_v51, %v3086_v27 }
 0x10b   : > { %v3087_v39 = vpop.f32.mrf.mxu0  ;;  %v3128_v48 = vpop.f32.mrf.mxu1 }
 0x10c   : > { %v914_v55 = vadd.f32 %v913_v20, %v893_v36  ;;  %v929_v58 = vmul.f32 %v893_v36, %v893_v36  ;;  %v951_v16 = vpack.c.bf16 %v893_v36, %v893_v36  ;;  %v3129_v42 = vadd.f32 %v3128_v48, %v3127_v38 }
 0x10d   : > { %v3088_v40 = vpop.f32.mrf.mxu0  ;;  %v3130_v6 = vpop.f32.mrf.mxu1 }
 0x10e   : > { %v936_v18 = vadd.f32 %v935_v63, %v929_v58  ;;  %959 = vst [vmem:[%s4391_s6 + $0x30] sm:$0xf] %v951_v16  ;;  %v3089_v57 = vadd.f32 %v3088_v40, %v3087_v39 }
 0x10f   : > { %v3090_v15 = vpop.f32.mrf.mxu0  ;;  %v3131_v60 = vpop.f32.mrf.mxu1 }
 0x110   : > { %v898_v1 = vadd.f32 %v3129_v42, %v3089_v57  ;;  %v3132_v26 = vadd.f32 %v3131_v60, %v3130_v6 }
 0x111   : > { %v3091_v62 = vpop.f32.mrf.mxu0 }
 0x112   : > { %v915_v54 = vadd.f32 %v914_v55, %v898_v1  ;;  %v930_v30 = vmul.f32 %v898_v1, %v898_v1  ;;  %v952_v56 = vpack.c.bf16 %v898_v1, %v898_v1  ;;  %v3092_v5 = vadd.f32 %v3091_v62, %v3090_v15 }
 0x114   : > { %v937_v31 = vadd.f32 %v936_v18, %v930_v30  ;;  %960 = vst [vmem:[%s4391_s6 + $0x40] sm:$0xf] %v952_v56  ;;  %v901_v4 = vadd.f32 %v3132_v26, %v3092_v5 }
 0x115   : > { %v3133_v21 = vpop.f32.mrf.mxu1 }
 0x116   : > { %v916_v45 = vadd.f32 %v915_v54, %v901_v4  ;;  %v931_v61 = vmul.f32 %v901_v4, %v901_v4  ;;  %v953_v14 = vpack.c.bf16 %v901_v4, %v901_v4 }
 0x117   : > { %v3134_v25 = vpop.f32.mrf.mxu1 }
 0x118   : > { %v3093_v35 = vpop.f32.mrf.mxu0  ;;  %v938_v44 = vadd.f32 %v937_v31, %v931_v61  ;;  %961 = vst [vmem:[%s4391_s6 + $0x50] sm:$0xf] %v953_v14  ;;  %v3135_v22 = vadd.f32 %v3134_v25, %v3133_v21 }
 0x119   : > { %v3136_v59 = vpop.f32.mrf.mxu1 }
 0x11a   : > { %v3094_v46 = vpop.f32.mrf.mxu0 }
 0x11b   : > { %v3095_v3 = vadd.f32 %v3094_v46, %v3093_v35  ;;  %v3137_v11 = vpop.f32.mrf.mxu1 }
 0x11c   : > { %v3096_v52 = vpop.f32.mrf.mxu0  ;;  %v3138_v7 = vadd.f32 %v3137_v11, %v3136_v59 }
 0x11d   : > { %v906_v19 = vadd.f32 %v3135_v22, %v3095_v3  ;;  %v3195_v34 = vpop.f32.mrf.mxu1 }
 0x11e   : > { %v3097_v23 = vpop.f32.mrf.mxu0 }
 0x11f   : > { %v917_v24 = vadd.f32 %v916_v45, %v906_v19  ;;  %v932_v33 = vmul.f32 %v906_v19, %v906_v19  ;;  %v954_v13 = vpack.c.bf16 %v906_v19, %v906_v19  ;;  %v3098_v49 = vadd.f32 %v3097_v23, %v3096_v52  ;;  %v3196_v53 = vpop.f32.mrf.mxu1 }
 0x120   : > { %v3155_v47 = vpop.f32.mrf.mxu0  ;;  %v3197_v9 = vadd.f32 %v3196_v53, %v3195_v34 }
 0x121   : > { %v939_v12 = vadd.f32 %v938_v44, %v932_v33  ;;  %962 = vst [vmem:[%s4391_s6 + $0x60] sm:$0xf] %v954_v13  ;;  %v909_v50 = vadd.f32 %v3138_v7, %v3098_v49  ;;  %v3198_v17 = vpop.f32.mrf.mxu1 }
 0x122   : > { %v3156_v10 = vpop.f32.mrf.mxu0 }
 0x123   : > { %v4400_v32 = vadd.f32 %v917_v24, %v909_v50  ;;  %v933_v8 = vmul.f32 %v909_v50, %v909_v50  ;;  %v955_v37 = vpack.c.bf16 %v909_v50, %v909_v50  ;;  %v3157_v0 = vadd.f32 %v3156_v10, %v3155_v47  ;;  %v3199_v51 = vpop.f32.mrf.mxu1 }
 0x124   : > { %v3158_v2 = vpop.f32.mrf.mxu0  ;;  %v3200_v29 = vadd.f32 %v3199_v51, %v3198_v17 }
 0x125   : > { %v4402_v28 = vadd.f32 %v939_v12, %v933_v8  ;;  %963 = vst [vmem:[%s4391_s6 + $0x70] sm:$0xf] %v955_v37  ;;  %v1518_v41 = vadd.f32 %v3197_v9, %v3157_v0  ;;  %v3201_v27 = vpop.f32.mrf.mxu1  ;;  %v919_v10 = vrot.slane %v4400_v32, 4 }
 0x126   : > { %v3159_v20 = vpop.f32.mrf.mxu0 }
 0x127   : > { %v1584_v43 = vpack.c.bf16 %v1518_v41, %v1518_v41  ;;  %v3160_v63 = vadd.f32 %v3159_v20, %v3158_v2  ;;  %v3202_v38 = vpop.f32.mrf.mxu1  ;;  %v1562_v18 = vmul.f32 %v1518_v41, %v1518_v41  ;;  %v941_v20 = vrot.slane %v4402_v28, 4 }
 0x128   : > { %v3161_v36 = vpop.f32.mrf.mxu0  ;;  %v3203_v16 = vadd.f32 %v3202_v38, %v3201_v27 }
 0x129   : > { %1592 = vst [vmem:[%s4391_s6 + $0x4] sm:$0xf] %v1584_v43  ;;  %v1521_v55 = vadd.f32 %v3200_v29, %v3160_v63  ;;  %v3204_v48 = vpop.f32.mrf.mxu1  ;;  %v920_v63 = vadd.f32 %v919_v10, %v4400_v32 }
 0x12a   : > { %v3162_v58 = vpop.f32.mrf.mxu0 }
 0x12b   : > { %v3163_v39 = vadd.f32 %v3162_v58, %v3161_v36  ;;  %v1548_v40 = vadd.f32 %v1521_v55, %v1518_v41  ;;  %v1563_v42 = vmul.f32 %v1521_v55, %v1521_v55  ;;  %v1585_v57 = vpack.c.bf16 %v1521_v55, %v1521_v55  ;;  %v3205_v1 = vpop.f32.mrf.mxu1 }
 0x12c   : > { %v3164_v6 = vpop.f32.mrf.mxu0  ;;  %v3206_v26 = vadd.f32 %v3205_v1, %v3204_v48 }
 0x12d   : > { %v1526_v15 = vadd.f32 %v3203_v16, %v3163_v39  ;;  %v1570_v60 = vadd.f32 %v1563_v42, %v1562_v18  ;;  %1593 = vst [vmem:[%s4391_s6 + $0x14] sm:$0xf] %v1585_v57  ;;  %v3207_v56 = vpop.f32.mrf.mxu1 }
 0x12e   : > { %v3165_v62 = vpop.f32.mrf.mxu0 }
 0x12f   : > { %v1549_v54 = vadd.f32 %v1548_v40, %v1526_v15  ;;  %v1564_v30 = vmul.f32 %v1526_v15, %v1526_v15  ;;  %v1586_v5 = vpack.c.bf16 %v1526_v15, %v1526_v15  ;;  %v3166_v31 = vadd.f32 %v3165_v62, %v3164_v6  ;;  %v3208_v61 = vpop.f32.mrf.mxu1 }
 0x130   : > { %v3167_v4 = vpop.f32.mrf.mxu0  ;;  %v3209_v35 = vadd.f32 %v3208_v61, %v3207_v56  ;;  %v942_v40 = vadd.f32 %v941_v20, %v4402_v28  ;;  %v921_v15 = vrot.slane %v920_v63, 2 }
 0x131   : > { %v1571_v45 = vadd.f32 %v1570_v60, %v1564_v30  ;;  %1594 = vst [vmem:[%s4391_s6 + $0x24] sm:$0xf] %v1586_v5  ;;  %v1529_v14 = vadd.f32 %v3206_v26, %v3166_v31  ;;  %v3210_v25 = vpop.f32.mrf.mxu1 }
 0x132   : > { %v3168_v21 = vpop.f32.mrf.mxu0  ;;  %v943_v5 = vrot.slane %v942_v40, 2 }
 0x133   : > { %v3169_v44 = vadd.f32 %v3168_v21, %v3167_v4  ;;  %v1550_v46 = vadd.f32 %v1549_v54, %v1529_v14  ;;  %v1565_v22 = vmul.f32 %v1529_v14, %v1529_v14  ;;  %v1587_v3 = vpack.c.bf16 %v1529_v14, %v1529_v14  ;;  %v3211_v19 = vpop.f32.mrf.mxu1 }
 0x134   : > { %v3170_v59 = vpop.f32.mrf.mxu0  ;;  %v3212_v7 = vadd.f32 %v3211_v19, %v3210_v25  ;;  %v922_v21 = vadd.f32 %v921_v15, %v920_v63 }
 0x135   : > { %v1534_v52 = vadd.f32 %v3209_v35, %v3169_v44  ;;  %v1572_v11 = vadd.f32 %v1571_v45, %v1565_v22  ;;  %1595 = vst [vmem:[%s4391_s6 + $0x34] sm:$0xf] %v1587_v3  ;;  %v3213_v34 = vpop.f32.mrf.mxu1 }
 0x136   : > { %v3171_v23 = vpop.f32.mrf.mxu0 }
 0x137   : > { %v1551_v24 = vadd.f32 %v1550_v46, %v1534_v52  ;;  %v1566_v33 = vmul.f32 %v1534_v52, %v1534_v52  ;;  %v1588_v13 = vpack.c.bf16 %v1534_v52, %v1534_v52  ;;  %v3172_v49 = vadd.f32 %v3171_v23, %v3170_v59  ;;  %v3214_v53 = vpop.f32.mrf.mxu1 }
 0x138   : > { %v3173_v47 = vpop.f32.mrf.mxu0  ;;  %v3215_v8 = vadd.f32 %v3214_v53, %v3213_v34  ;;  %v944_v59 = vadd.f32 %v943_v5, %v942_v40 }
 0x139   : > { %v1573_v12 = vadd.f32 %v1572_v11, %v1566_v33  ;;  %1596 = vst [vmem:[%s4391_s6 + $0x44] sm:$0xf] %v1588_v13  ;;  %v1537_v50 = vadd.f32 %v3212_v7, %v3172_v49  ;;  %v3216_v41 = vpop.f32.mrf.mxu1  ;;  %v923_v33 = vrot.slane %v922_v21, 1 }
 0x13a   : > { %v3174_v9 = vpop.f32.mrf.mxu0  ;;  %v945_v53 = vrot.slane %v944_v59, 1 }
 0x13b   : > { %v1552_v37 = vadd.f32 %v1551_v24, %v1537_v50  ;;  %v1567_v0 = vmul.f32 %v1537_v50, %v1537_v50  ;;  %v1589_v17 = vpack.c.bf16 %v1537_v50, %v1537_v50  ;;  %v3175_v2 = vadd.f32 %v3174_v9, %v3173_v47  ;;  %v3217_v27 = vpop.f32.mrf.mxu1 }
 0x13c   : > { %v3176_v51 = vpop.f32.mrf.mxu0  ;;  %v3218_v38 = vadd.f32 %v3217_v27, %v3216_v41  ;;  %v946_v63 = vadd.f32 %v945_v53, %v944_v59 }
 0x13d   : > { %v1574_v29 = vadd.f32 %v1573_v12, %v1567_v0  ;;  %1597 = vst [vmem:[%s4391_s6 + $0x54] sm:$0xf] %v1589_v17  ;;  %v1542_v43 = vadd.f32 %v3215_v8, %v3175_v2  ;;  %v3275_v48 = vpop.f32.mrf.mxu1  ;;  %v924_v2 = vadd.f32 %v923_v33, %v922_v21 }
 0x13e   : > { %v3177_v36 = vpop.f32.mrf.mxu0 }
 0x13f   : > { %v1553_v55 = vadd.f32 %v1552_v37, %v1542_v43  ;;  %v1568_v58 = vmul.f32 %v1542_v43, %v1542_v43  ;;  %v1590_v16 = vpack.c.bf16 %v1542_v43, %v1542_v43  ;;  %v3178_v39 = vadd.f32 %v3177_v36, %v3176_v51  ;;  %v3276_v6 = vpop.f32.mrf.mxu1 }
 0x140   : > { %v3235_v18 = vpop.f32.mrf.mxu0  ;;  %v3277_v60 = vadd.f32 %v3276_v6, %v3275_v48 }
 0x141   : > { %v1575_v42 = vadd.f32 %v1574_v29, %v1568_v58  ;;  %1598 = vst [vmem:[%s4391_s6 + $0x64] sm:$0xf] %v1590_v16  ;;  %v1545_v57 = vadd.f32 %v3218_v38, %v3178_v39  ;;  %v3278_v30 = vpop.f32.mrf.mxu1 }
 0x142   : > { %v3236_v1 = vpop.f32.mrf.mxu0 }
 0x143   : > { %v1554_v62 = vadd.f32 %v1553_v55, %v1545_v57  ;;  %v1569_v32 = vmul.f32 %v1545_v57, %v1545_v57  ;;  %v1591_v26 = vpack.c.bf16 %v1545_v57, %v1545_v57  ;;  %v3237_v54 = vadd.f32 %v3236_v1, %v3235_v18  ;;  %v3279_v45 = vpop.f32.mrf.mxu1 }
 0x144   : > { %v3238_v56 = vpop.f32.mrf.mxu0  ;;  %v3280_v14 = vadd.f32 %v3279_v45, %v3278_v30 }
 0x145   : > { %v1555_v31 = vrot.slane %v1554_v62, 4  ;;  %v1576_v4 = vadd.f32 %v1575_v42, %v1569_v32  ;;  %1599 = vst [vmem:[%s4391_s6 + $0x74] sm:$0xf] %v1591_v26  ;;  %v4417_v28 = vadd.f32 %v3277_v60, %v3237_v54  ;;  %v3281_v46 = vpop.f32.mrf.mxu1 }
 0x146   : > { %v3239_v61 = vpop.f32.mrf.mxu0 }
 0x147   : > { %v1556_v35 = vadd.f32 %v1555_v31, %v1554_v62  ;;  %v1577_v44 = vrot.slane %v1576_v4, 4  ;;  %v2059_v25 = vpack.c.bf16 %v4417_v28, %v4417_v28  ;;  %v3240_v22 = vadd.f32 %v3239_v61, %v3238_v56  ;;  %v3282_v11 = vpop.f32.mrf.mxu1 }
 0x148   : > { %v3241_v3 = vpop.f32.mrf.mxu0  ;;  %v3283_v24 = vadd.f32 %v3282_v11, %v3281_v46 }
 0x149   : > { %v1557_v52 = vrot.slane %v1556_v35, 2  ;;  %v1578_v19 = vadd.f32 %v1577_v44, %v1576_v4  ;;  %2939 = vst [vmem:[%s4391_s6 + $0x8] sm:$0xf] %v2059_v25  ;;  %v4422_v23 = vadd.f32 %v3280_v14, %v3240_v22  ;;  %v3284_v47 = vpop.f32.mrf.mxu1 }
 0x14a   : > { %v3242_v7 = vpop.f32.mrf.mxu0 }
 0x14b   : > { %v1558_v13 = vadd.f32 %v1557_v52, %v1556_v35  ;;  %v1579_v49 = vrot.slane %v1578_v19, 2  ;;  %v3243_v34 = vadd.f32 %v3242_v7, %v3241_v3  ;;  %v2060_v12 = vpack.c.bf16 %v4422_v23, %v4422_v23  ;;  %v3285_v37 = vpop.f32.mrf.mxu1 }
 0x14c   : > { %v3244_v50 = vpop.f32.mrf.mxu0  ;;  %v3286_v17 = vadd.f32 %v3285_v37, %v3284_v47  ;;  %v2023_v37 = vadd.f32 %v4422_v23, %v4417_v28 }
 0x14d   : > { %v1559_v10 = vrot.slane %v1558_v13, 1  ;;  %v1580_v9 = vadd.f32 %v1579_v49, %v1578_v19  ;;  %v4426_v8 = vadd.f32 %v3283_v24, %v3243_v34  ;;  %2940 = vst [vmem:[%s4391_s6 + $0x18] sm:$0xf] %v2060_v12  ;;  %v3287_v20 = vpop.f32.mrf.mxu1 }
 0x14e   : > { %v3245_v0 = vpop.f32.mrf.mxu0 }
 0x14f   : > { %v1560_v41 = vadd.f32 %v1559_v10, %v1558_v13  ;;  %v1581_v51 = vrot.slane %v1580_v9, 1  ;;  %v2061_v29 = vpack.c.bf16 %v4426_v8, %v4426_v8  ;;  %v3246_v43 = vadd.f32 %v3245_v0, %v3244_v50  ;;  %v3288_v55 = vpop.f32.mrf.mxu1 }
 0x150   : > { %v3247_v27 = vpop.f32.mrf.mxu0  ;;  %v3289_v39 = vadd.f32 %v3288_v55, %v3287_v20  ;;  %v2038_v13 = vmul.f32 %v4422_v23, %v4422_v23  ;;  %v2037_v50 = vmul.f32 %v4417_v28, %v4417_v28  ;;  %v2039_v53 = vmul.f32 %v4426_v8, %v4426_v8 }
 0x151   : > { %v4431_v36 = vadd.f32 %v1560_v41, %v924_v2  ;;  %v1582_v38 = vadd.f32 %v1581_v51, %v1580_v9  ;;  %2941 = vst [vmem:[%s4391_s6 + $0x28] sm:$0xf] %v2061_v29  ;;  %v4434_v58 = vadd.f32 %v3286_v17, %v3246_v43  ;;  %v3290_v40 = vpop.f32.mrf.mxu1  ;;  %v2024_v29 = vadd.f32 %v2023_v37, %v4426_v8 }
 0x152   : > { %v3248_v16 = vpop.f32.mrf.mxu0  ;;  %v2045_v2 = vadd.f32 %v2038_v13, %v2037_v50 }
 0x153   : > { %v4436_v48 = vadd.f32 %v1582_v38, %v946_v63  ;;  %v3249_v18 = vadd.f32 %v3248_v16, %v3247_v27  ;;  %v2062_v42 = vpack.c.bf16 %v4434_v58, %v4434_v58  ;;  %v3291_v15 = vpop.f32.mrf.mxu1  ;;  %v2040_v41 = vmul.f32 %v4434_v58, %v4434_v58 }
 0x154   : > { %v3250_v57 = vpop.f32.mrf.mxu0  ;;  %v3292_v60 = vadd.f32 %v3291_v15, %v3290_v40  ;;  %v2046_v63 = vadd.f32 %v2045_v2, %v2039_v53  ;;  %v2025_v55 = vadd.f32 %v2024_v29, %v4434_v58 }
 0x155   : > { %v4440_v6 = vadd.f32 %v3289_v39, %v3249_v18  ;;  %2942 = vst [vmem:[%s4391_s6 + $0x38] sm:$0xf] %v2062_v42  ;;  %v3293_v26 = vpop.f32.mrf.mxu1 }
 0x156   : > { %v3251_v1 = vpop.f32.mrf.mxu0  ;;  %v2047_v18 = vadd.f32 %v2046_v63, %v2040_v41 }
 0x157   : > { %v2063_v62 = vpack.c.bf16 %v4440_v6, %v4440_v6  ;;  %v3252_v32 = vadd.f32 %v3251_v1, %v3250_v57  ;;  %v3294_v30 = vpop.f32.mrf.mxu1  ;;  %v2041_v38 = vmul.f32 %v4440_v6, %v4440_v6  ;;  %v2026_v57 = vadd.f32 %v2025_v55, %v4440_v6 }
 0x158   : > { %v3295_v4 = vadd.f32 %v3294_v30, %v3293_v26 }
 0x159   : > { %2943 = vst [vmem:[%s4391_s6 + $0x48] sm:$0xf] %v2063_v62  ;;  %v4446_v54 = vadd.f32 %v3292_v60, %v3252_v32  ;;  %v3296_v5 = vpop.f32.mrf.mxu1  ;;  %v2048_v60 = vadd.f32 %v2047_v18, %v2041_v38 }
 0x15a   : > { %v3253_v31 = vpop.f32.mrf.mxu0 }
 0x15b   : > { %v2064_v56 = vpack.c.bf16 %v4446_v54, %v4446_v54  ;;  %v3297_v45 = vpop.f32.mrf.mxu1  ;;  %v2042_v40 = vmul.f32 %v4446_v54, %v4446_v54  ;;  %v2027_v26 = vadd.f32 %v2026_v57, %v4446_v54 }
 0x15c   : > { %v3254_v61 = vpop.f32.mrf.mxu0  ;;  %v3298_v25 = vadd.f32 %v3297_v45, %v3296_v5 }
 0x15d   : > { %2944 = vst [vmem:[%s4391_s6 + $0x58] sm:$0xf] %v2064_v56  ;;  %v3255_v14 = vadd.f32 %v3254_v61, %v3253_v31  ;;  %v2049_v5 = vadd.f32 %v2048_v60, %v2042_v40 }
 0x15e   : > { %v3355_v21 = vpop.f32.mrf.mxu1  ;;  %v3256_v35 = vpop.f32.mrf.mxu0 }
 0x15f   : > { %v2017_v44 = vadd.f32 %v3295_v4, %v3255_v14 }
 0x160   : > { %v3356_v46 = vpop.f32.mrf.mxu1  ;;  %v3257_v22 = vpop.f32.mrf.mxu0 }
 0x161   : > { %v2065_v3 = vpack.c.bf16 %v2017_v44, %v2017_v44  ;;  %v3258_v59 = vadd.f32 %v3257_v22, %v3256_v35  ;;  %v3357_v7 = vadd.f32 %v3356_v46, %v3355_v21  ;;  %v2043_v30 = vmul.f32 %v2017_v44, %v2017_v44 }
 0x162   : > { %v3358_v52 = vpop.f32.mrf.mxu1  ;;  %v3315_v19 = vpop.f32.mrf.mxu0  ;;  %v2028_v4 = vadd.f32 %v2027_v26, %v2017_v44 }
 0x163   : > { %2945 = vst [vmem:[%s4391_s6 + $0x68] sm:$0xf] %v2065_v3  ;;  %v2020_v11 = vadd.f32 %v3298_v25, %v3258_v59  ;;  %v2050_v25 = vadd.f32 %v2049_v5, %v2043_v30 }
 0x164   : > { %v3359_v24 = vpop.f32.mrf.mxu1  ;;  %v3316_v33 = vpop.f32.mrf.mxu0 }
 0x165   : > { %v2066_v49 = vpack.c.bf16 %v2020_v11, %v2020_v11  ;;  %v3317_v34 = vadd.f32 %v3316_v33, %v3315_v19  ;;  %v3360_v17 = vadd.f32 %v3359_v24, %v3358_v52  ;;  %v2044_v45 = vmul.f32 %v2020_v11, %v2020_v11 }
 0x166   : > { %v3361_v47 = vpop.f32.mrf.mxu1  ;;  %v3318_v12 = vpop.f32.mrf.mxu0  ;;  %v2029_v46 = vadd.f32 %v2028_v4, %v2020_v11 }
 0x167   : > { %2946 = vst [vmem:[%s4391_s6 + $0x78] sm:$0xf] %v2066_v49  ;;  %v4459_v10 = vadd.f32 %v3357_v7, %v3317_v34  ;;  %v2051_v52 = vadd.f32 %v2050_v25, %v2044_v45 }
 0x168   : > { %v3362_v9 = vpop.f32.mrf.mxu1  ;;  %v3319_v0 = vpop.f32.mrf.mxu0  ;;  %v2030_v49 = vrot.slane %v2029_v46, 4 }
 0x169   : > { %v2521_v51 = vpack.c.bf16 %v4459_v10, %v4459_v10  ;;  %v3320_v43 = vadd.f32 %v3319_v0, %v3318_v12  ;;  %v3363_v28 = vadd.f32 %v3362_v9, %v3361_v47  ;;  %v2499_v34 = vmul.f32 %v4459_v10, %v4459_v10 }
 0x16a   : > { %v3364_v20 = vpop.f32.mrf.mxu1  ;;  %v3321_v27 = vpop.f32.mrf.mxu0  ;;  %v2052_v37 = vrot.slane %v2051_v52, 4  ;;  %v2031_v29 = vadd.f32 %v2030_v49, %v2029_v46 }
 0x16b   : > { %3048 = vst [vmem:[%s4391_s6 + $0xc] sm:$0xf] %v2521_v51  ;;  %v2458_v16 = vadd.f32 %v3360_v17, %v3320_v43 }
 0x16c   : > { %v3365_v23 = vpop.f32.mrf.mxu1  ;;  %v3322_v39 = vpop.f32.mrf.mxu0  ;;  %v2053_v55 = vadd.f32 %v2052_v37, %v2051_v52  ;;  %v2032_v57 = vrot.slane %v2031_v29, 2 }
 0x16d   : > { %v3323_v42 = vadd.f32 %v3322_v39, %v3321_v27  ;;  %v2522_v15 = vpack.c.bf16 %v2458_v16, %v2458_v16  ;;  %v3366_v56 = vadd.f32 %v3365_v23, %v3364_v20  ;;  %v2500_v19 = vmul.f32 %v2458_v16, %v2458_v16 }
 0x16e   : > { %v3367_v8 = vpop.f32.mrf.mxu1  ;;  %v3324_v1 = vpop.f32.mrf.mxu0  ;;  %v2485_v12 = vadd.f32 %v2458_v16, %v4459_v10  ;;  %v2054_v30 = vrot.slane %v2053_v55, 2 }
 0x16f   : > { %v2463_v62 = vadd.f32 %v3363_v28, %v3323_v42  ;;  %3049 = vst [vmem:[%s4391_s6 + $0x1c] sm:$0xf] %v2522_v15  ;;  %v2507_v0 = vadd.f32 %v2500_v19, %v2499_v34 }
 0x170   : > { %v3368_v32 = vpop.f32.mrf.mxu1  ;;  %v3325_v58 = vpop.f32.mrf.mxu0 }
 0x171   : > { %v2523_v61 = vpack.c.bf16 %v2463_v62, %v2463_v62  ;;  %v3326_v14 = vadd.f32 %v3325_v58, %v3324_v1  ;;  %v3369_v6 = vadd.f32 %v3368_v32, %v3367_v8  ;;  %v2501_v47 = vmul.f32 %v2463_v62, %v2463_v62 }
 0x172   : > { %v3370_v31 = vpop.f32.mrf.mxu1  ;;  %v3327_v21 = vpop.f32.mrf.mxu0  ;;  %v2486_v41 = vadd.f32 %v2485_v12, %v2463_v62 }
 0x173   : > { %3050 = vst [vmem:[%s4391_s6 + $0x2c] sm:$0xf] %v2523_v61  ;;  %v2466_v22 = vadd.f32 %v3366_v56, %v3326_v14  ;;  %v2508_v43 = vadd.f32 %v2507_v0, %v2501_v47 }
 0x174   : > { %v3371_v35 = vpop.f32.mrf.mxu1  ;;  %v3328_v54 = vpop.f32.mrf.mxu0 }
 0x175   : > { %v3329_v3 = vadd.f32 %v3328_v54, %v3327_v21  ;;  %v2524_v7 = vpack.c.bf16 %v2466_v22, %v2466_v22  ;;  %v3372_v44 = vadd.f32 %v3371_v35, %v3370_v31  ;;  %v2502_v17 = vmul.f32 %v2466_v22, %v2466_v22 }
 0x176   : > { %v3373_v59 = vpop.f32.mrf.mxu1  ;;  %v3330_v24 = vpop.f32.mrf.mxu0  ;;  %v2487_v28 = vadd.f32 %v2486_v41, %v2466_v22  ;;  %v2033_v31 = vadd.f32 %v2032_v57, %v2031_v29  ;;  %v2055_v21 = vadd.f32 %v2054_v30, %v2053_v55 }
 0x177   : > { %v2471_v33 = vadd.f32 %v3369_v6, %v3329_v3  ;;  %3051 = vst [vmem:[%s4391_s6 + $0x3c] sm:$0xf] %v2524_v7  ;;  %v2509_v16 = vadd.f32 %v2508_v43, %v2502_v17 }
 0x178   : > { %v3374_v13 = vpop.f32.mrf.mxu1  ;;  %v3331_v11 = vpop.f32.mrf.mxu0  ;;  %v2034_v25 = vrot.slane %v2033_v31, 1  ;;  %v2056_v54 = vrot.slane %v2055_v21, 1 }
 0x179   : > { %v2525_v50 = vpack.c.bf16 %v2471_v33, %v2471_v33  ;;  %v3332_v53 = vadd.f32 %v3331_v11, %v3330_v24  ;;  %v3375_v20 = vadd.f32 %v3374_v13, %v3373_v59  ;;  %v2503_v27 = vmul.f32 %v2471_v33, %v2471_v33 }
 0x17a   : > { %v3376_v9 = vpop.f32.mrf.mxu1  ;;  %v3333_v2 = vpop.f32.mrf.mxu0  ;;  %v2488_v18 = vadd.f32 %v2487_v28, %v2471_v33  ;;  %v2035_v52 = vadd.f32 %v2034_v25, %v2033_v31  ;;  %v2057_v24 = vadd.f32 %v2056_v54, %v2055_v21 }
 0x17b   : > { %3052 = vst [vmem:[%s4391_s6 + $0x4c] sm:$0xf] %v2525_v50  ;;  %v2474_v51 = vadd.f32 %v3372_v44, %v3332_v53  ;;  %v2510_v15 = vadd.f32 %v2509_v16, %v2503_v27 }
 0x17c   : > { %v3334_v63 = vpop.f32.mrf.mxu0  ;;  %v3377_v38 = vpop.f32.mrf.mxu1  ;;  %v2036_v13 = vadd.f32 %v2035_v52, %v4431_v36  ;;  %v2058_v47 = vadd.f32 %v2057_v24, %v4436_v48 }
 0x17d   : > { %v2526_v23 = vpack.c.bf16 %v2474_v51, %v2474_v51  ;;  %v3335_v10 = vadd.f32 %v3334_v63, %v3333_v2  ;;  %v2504_v40 = vmul.f32 %v2474_v51, %v2474_v51  ;;  %v3378_v8 = vadd.f32 %v3377_v38, %v3376_v9 }
 0x17e   : > { %v3336_v39 = vpop.f32.mrf.mxu0  ;;  %v2489_v60 = vadd.f32 %v2488_v18, %v2474_v51 }
 0x17f   : > { %3053 = vst [vmem:[%s4391_s6 + $0x5c] sm:$0xf] %v2526_v23  ;;  %v2479_v42 = vadd.f32 %v3375_v20, %v3335_v10  ;;  %v2511_v58 = vadd.f32 %v2510_v15, %v2504_v40 }
 0x180   : > { %v3337_v1 = vpop.f32.mrf.mxu0 }
 0x181   : > { %v2505_v62 = vmul.f32 %v2479_v42, %v2479_v42  ;;  %v2527_v32 = vpack.c.bf16 %v2479_v42, %v2479_v42  ;;  %v3338_v26 = vadd.f32 %v3337_v1, %v3336_v39  ;;  %v2490_v56 = vadd.f32 %v2489_v60, %v2479_v42 }
 0x183   : > { %3054 = vst [vmem:[%s4391_s6 + $0x6c] sm:$0xf] %v2527_v32  ;;  %v2482_v5 = vadd.f32 %v3378_v8, %v3338_v26  ;;  %v2512_v4 = vadd.f32 %v2511_v58, %v2505_v62 }
 0x185   : > { %v2491_v45 = vadd.f32 %v2490_v56, %v2482_v5  ;;  %v2506_v61 = vmul.f32 %v2482_v5, %v2482_v5  ;;  %v2528_v14 = vpack.c.bf16 %v2482_v5, %v2482_v5 }
 0x187   : > { %v2492_v6 = vrot.slane %v2491_v45, 4  ;;  %v2513_v35 = vadd.f32 %v2512_v4, %v2506_v61  ;;  %3055 = vst [vmem:[%s4391_s6 + $0x7c] sm:$0xf] %v2528_v14 }
 0x189   : > { %v2493_v46 = vadd.f32 %v2492_v6, %v2491_v45  ;;  %v2514_v22 = vrot.slane %v2513_v35, 4 }
 0x18b   : > { %v2494_v3 = vrot.slane %v2493_v46, 2  ;;  %v2515_v59 = vadd.f32 %v2514_v22, %v2513_v35 }
 0x18d   : > { %v2495_v19 = vadd.f32 %v2494_v3, %v2493_v46  ;;  %v2516_v7 = vrot.slane %v2515_v59, 2 }
 0x18f   : > { %v2496_v33 = vrot.slane %v2495_v19, 1  ;;  %v2517_v44 = vadd.f32 %v2516_v7, %v2515_v59 }
 0x191   : > { %v2497_v49 = vadd.f32 %v2496_v33, %v2495_v19  ;;  %v2518_v34 = vrot.slane %v2517_v44, 1 }
 0x193   : > { %v2498_v11 = vadd.f32 %v2497_v49, %v2036_v13  ;;  %v2519_v12 = vadd.f32 %v2518_v34, %v2517_v44 }
 0x195   : > { %v2520_v50 = vadd.f32 %v2519_v12, %v2058_v47  ;;  %2537 = vst [vmem:[%s181_s10] sm:$0x1] %v2498_v11 }
 0x197   : > { %2538 = vst [vmem:[%s181_s10 + $0x1] sm:$0x1] %v2520_v50 }
 0x198 PF: > { %s14_s12 = sadd.s32 1, %s3542_s12  }
 0x199   : > { %p11_p4 = scmp.ge.s32.totalorder %s14_s12, 4  }
 0x19b   :  { %13 = sbr.rel (!%p11_p4) target bundleno = 1 (0x1), region = 74 }

</bundles_post_ra>
